<compile_context>
chip_gen: v5e
topology: v5e:2x2
jax: 0.10.0
libtpu: 0.0.40
codegen_flags: <defaults>
</compile_context>

<pallas_src>
import math

import jax
import jax.numpy as jnp
from jax import lax
from jax.experimental import pallas as pl
from jax.experimental.pallas import tpu as pltpu

# ----------------------------- configuration --------------------------------
B = 4                      # graphs per batch
BG = 2                     # graphs per grid step; grid=(B//BG,) "parallel"
                           # feeds both v7x TCs.  On 1-TC chips (v5e/v6e) set
                           # BG = B (grid=(1,)) when VMEM allows.
NBLK = B // BG             # grid size
N = 8                      # nodes per graph (stand-in for the hard-coded 330)
C_IN = 4                   # in_channels
HIDDEN = 32                # hidden_channels
OUT_CH = 1                 # out_channels
EDGE_DIM = 5               # TransformerConv edge_dim
K1 = math.ceil(0.5 * N)    # mincut clusters, level 1  (average_nodes == N)
K2 = math.ceil(0.5 * K1)   # mincut clusters, level 2
LN_EPS = 1e-5              # torch.nn.LayerNorm default eps
EPS = 1e-15                # dense_mincut_pool EPS
ATTN_SCALE = 1.0 / math.sqrt(HIDDEN)

# ------------------------------ parameter packing ----------------------------
# All (fused) weights/biases live in a single [P_ROWS, 128] f32 slab; each
# entry starts at an 8-aligned row offset and occupies its natural column
# width (max width is 4*HIDDEN == 128 for the fused qkv/skip projection).
P_LANE = 128

_SLAB_SHAPES = [
    ("wqkvs", (C_IN, 4 * HIDDEN)), ("bqkvs", (1, 4 * HIDDEN)),   # fused q|k|v|skip
    ("we", (EDGE_DIM, HIDDEN)), ("weT", (HIDDEN, EDGE_DIM)),     # lin_edge (+T)
    ("g1", (1, HIDDEN)), ("be1", (1, HIDDEN)),
    ("wm1", (HIDDEN, K1)), ("bm1", (1, K1)),
    ("wconv2", (2 * HIDDEN, HIDDEN)), ("brel2", (1, HIDDEN)),    # [w_rel; w_root]
    ("g2", (1, HIDDEN)), ("be2", (1, HIDDEN)),
    ("wm2", (HIDDEN, K2)), ("bm2", (1, K2)),
    ("wconv3", (2 * HIDDEN, HIDDEN)), ("brel3", (1, HIDDEN)),
    ("g3", (1, HIDDEN)), ("be3", (1, HIDDEN)),
    ("wl1", (HIDDEN, HIDDEN)), ("bl1", (1, HIDDEN)),
    ("wro", (HIDDEN, OUT_CH)), ("bro", (1, OUT_CH)),
]
_SLAB_DICT = dict(_SLAB_SHAPES)
_SLAB_OFFSETS = {}
_off = 0
for _name, _shape in _SLAB_SHAPES:
    _SLAB_OFFSETS[_name] = _off
    _off += ((_shape[0] + 7) // 8) * 8          # keep every slice sublane-aligned
P_ROWS = _off                                    # multiple of 8


def init_params(key):
    """Per-layer parameters with the same shapes as the torch modules."""
    shapes = {
        "wq": (C_IN, HIDDEN), "bq": (1, HIDDEN),
        "wk": (C_IN, HIDDEN), "bk": (1, HIDDEN),
        "wv": (C_IN, HIDDEN), "bv": (1, HIDDEN),
        "we": (EDGE_DIM, HIDDEN),
        "wskip": (C_IN, HIDDEN), "bskip": (1, HIDDEN),
        "wm1": (HIDDEN, K1), "bm1": (1, K1),
        "wrel2": (HIDDEN, HIDDEN), "brel2": (1, HIDDEN), "wroot2": (HIDDEN, HIDDEN),
        "wm2": (HIDDEN, K2), "bm2": (1, K2),
        "wrel3": (HIDDEN, HIDDEN), "brel3": (1, HIDDEN), "wroot3": (HIDDEN, HIDDEN),
        "wl1": (HIDDEN, HIDDEN), "bl1": (1, HIDDEN),
        "wro": (HIDDEN, OUT_CH), "bro": (1, OUT_CH),
    }
    keys = jax.random.split(key, len(shapes))
    params = {name: 0.1 * jax.random.normal(k, s, dtype=jnp.float32)
              for (name, s), k in zip(shapes.items(), keys)}
    for n in ("g1", "g2", "g3"):
        params[n] = jnp.ones((1, HIDDEN), jnp.float32)     # LayerNorm gamma
    for n in ("be1", "be2", "be3"):
        params[n] = jnp.zeros((1, HIDDEN), jnp.float32)    # LayerNorm beta
    return params


def pack_params(p):
    """Fuse + pack all parameters into the single [P_ROWS, 128] slab."""
    fused = {
        # attention scale folded into the q columns (exact; scores are linear in q)
        "wqkvs": jnp.concatenate(
            [p["wq"] * ATTN_SCALE, p["wk"], p["wv"], p["wskip"]], axis=1),
        "bqkvs": jnp.concatenate(
            [p["bq"] * ATTN_SCALE, p["bk"], p["bv"], p["bskip"]], axis=1),
        "we": p["we"], "weT": p["we"].T,
        "g1": p["g1"], "be1": p["be1"],
        "wm1": p["wm1"], "bm1": p["bm1"],
        "wconv2": jnp.concatenate([p["wrel2"], p["wroot2"]], axis=0),
        "brel2": p["brel2"],
        "g2": p["g2"], "be2": p["be2"],
        "wm2": p["wm2"], "bm2": p["bm2"],
        "wconv3": jnp.concatenate([p["wrel3"], p["wroot3"]], axis=0),
        "brel3": p["brel3"],
        "g3": p["g3"], "be3": p["be3"],
        "wl1": p["wl1"], "bl1": p["bl1"],
        "wro": p["wro"], "bro": p["bro"],
    }
    packed = jnp.zeros((P_ROWS, P_LANE), jnp.float32)
    for name, shape in _SLAB_SHAPES:
        off = _SLAB_OFFSETS[name]
        packed = packed.at[off:off + shape[0], :shape[1]].set(fused[name])
    return packed


# ------------------------------ kernel helpers -------------------------------
def _layernorm_relu(h, gamma, beta):
    mu = jnp.mean(h, axis=-1, keepdims=True)
    var = jnp.mean((h - mu) ** 2, axis=-1, keepdims=True)
    hhat = (h - mu) * lax.rsqrt(var + LN_EPS)
    return jnp.maximum(hhat * gamma + beta, 0.0)


def _softmax_last(z):
    m = jnp.max(z, axis=-1, keepdims=True)
    e = jnp.exp(z - m)
    return e * pl.reciprocal(jnp.sum(e, axis=-1, keepdims=True), approx=True)


def _mincut_pool(h3, adj, s_logits):
    # dense_mincut_pool (mask all-True). Only pooled x / normalized adj are
    # needed — the mincut / ortho aux losses do not affect class_1.
    s = _softmax_last(s_logits)                                     # [b, n, k]
    x_p = jnp.einsum('bnk,bnh->bkh', s, h3,
                     preferred_element_type=jnp.float32)            # s^T x
    sa = jnp.einsum('bnk,bnm->bkm', s, adj,
                    preferred_element_type=jnp.float32)             # s^T A
    adj_p = jnp.einsum('bkm,bmj->bkj', sa, s,
                       preferred_element_type=jnp.float32)          # s^T A s
    k = adj_p.shape[-1]
    row = lax.broadcasted_iota(jnp.int32, (k, k), 0)
    col = lax.broadcasted_iota(jnp.int32, (k, k), 1)
    adj_nd = jnp.where((row == col)[None, :, :], 0.0, adj_p)        # zero diag
    dsq = jnp.sqrt(jnp.sum(adj_nd, axis=-1, keepdims=True)) + EPS   # [b, k, 1]
    inv_dsq = pl.reciprocal(dsq, approx=True)
    adj_norm = adj_nd * inv_dsq * jnp.swapaxes(inv_dsq, -1, -2)
    return x_p, adj_norm


def _dense_graph_conv(h3, adj, w_fused, b_rel):
    # DenseGraphConv(aggr='add'): lin_rel(adj @ x) + lin_root(x), fused as
    # [agg | x] @ [[w_rel];[w_root]] + b_rel   (one MXU issue, depth 2H).
    bg, n, hdim = h3.shape
    agg = jnp.einsum('bnm,bmh->bnh', adj, h3,
                     preferred_element_type=jnp.float32)
    cat = jnp.concatenate([agg, h3], axis=-1).reshape(bg * n, 2 * hdim)
    out = jnp.dot(cat, w_fused, preferred_element_type=jnp.float32) + b_rel
    return out.reshape(bg, n, HIDDEN)


# --------------------------------- kernel ------------------------------------
def model_kernel(x_ref, adj_ref, adjt_ref, ea_ref, p_ref, out_ref):
    def g(name):
        off = _SLAB_OFFSETS[name]
        r, c = _SLAB_DICT[name]
        return p_ref[off:off + r, :c]          # static, sublane-aligned slice

    x = x_ref[...]         # [BG, N, C_in]
    adj = adj_ref[...]     # [BG, N(src), N(dst)]   — pooling orientation
    adjt = adjt_ref[...]   # [BG, N(dst), N(src)]   — attention-mask orientation
    ea = ea_ref[...]       # [BG, E, N(dst), N(src)] — lane-dense over src

    # ---- TransformerConv (heads=1, concat=True, eval mode) ------------------
    # TODO(synk): attention dropout is training-only; kernel implements eval mode.
    xf = x.reshape(BG * N, C_IN)
    # one lane-dense fused projection: q(scaled) | k | v | skip
    qkvs = jnp.dot(xf, g("wqkvs"), preferred_element_type=jnp.float32) + g("bqkvs")
    q = qkvs[:, 0 * HIDDEN:1 * HIDDEN]
    k = qkvs[:, 1 * HIDDEN:2 * HIDDEN]
    v = qkvs[:, 2 * HIDDEN:3 * HIDDEN]
    skip = qkvs[:, 3 * HIDDEN:4 * HIDDEN]

    q3 = q.reshape(BG, N, HIDDEN)
    k3 = k.reshape(BG, N, HIDDEN)
    v3 = v.reshape(BG, N, HIDDEN)

    # edge score term: q_dst . (We e_{src->dst}).  The per-channel dot products
    # are ONE small matmul (MXU) instead of 5 cross-lane reductions (XLU).
    qwe = jnp.dot(q, g("weT"),
                  preferred_element_type=jnp.float32).reshape(BG, N, EDGE_DIM)
    edge_term = jnp.zeros((BG, N, N), jnp.float32)                  # [b, dst, src]
    for e in range(EDGE_DIM):
        edge_term = edge_term + ea[:, e] * qwe[:, :, e:e + 1]

    # q is pre-scaled, so no extra [N,N] scale multiply here.
    scores = jnp.einsum('bdh,bsh->bds', q3, k3,
                        preferred_element_type=jnp.float32) + edge_term
    mask = adjt > 0.0                                               # [b, dst, src]
    scores = jnp.where(mask, scores, jnp.float32(-1e30))
    m = jnp.max(scores, axis=-1, keepdims=True)
    ex = jnp.where(mask, jnp.exp(scores - m), 0.0)
    denom = jnp.sum(ex, axis=-1, keepdims=True)
    inv_denom = pl.reciprocal(jnp.where(denom == 0.0, 1.0, denom), approx=True)
    alpha = ex * inv_denom                                          # [b, dst, src]

    # out_i = sum_j alpha[i,j] * (v_j + We e_{j->i}) + skip(x_i)
    attn = jnp.einsum('bds,bsh->bdh', alpha, v3,
                      preferred_element_type=jnp.float32)
    # accumulate per-channel attention-weighted edge sums, finish with one MXU op
    t_cols = [jnp.sum(alpha * ea[:, e], axis=-1, keepdims=True)
              for e in range(EDGE_DIM)]
    t = jnp.concatenate(t_cols, axis=-1).reshape(BG * N, EDGE_DIM)  # [BG*N, E]
    edge_out = jnp.dot(t, g("we"), preferred_element_type=jnp.float32)

    h = attn.reshape(BG * N, HIDDEN) + edge_out + skip
    h = _layernorm_relu(h, g("g1"), g("be1"))                       # ln1 + relu

    # ---- level 1: mlp1 -> mincut pool ---------------------------------------
    s = jnp.dot(h, g("wm1"), preferred_element_type=jnp.float32) + g("bm1")
    h3, a = _mincut_pool(h.reshape(BG, N, HIDDEN), adj, s.reshape(BG, N, K1))

    # ---- level 2: conv2 -> ln2/relu -> mlp2 -> pool --------------------------
    h3 = _dense_graph_conv(h3, a, g("wconv2"), g("brel2"))
    hf = _layernorm_relu(h3.reshape(BG * K1, HIDDEN), g("g2"), g("be2"))
    s = jnp.dot(hf, g("wm2"), preferred_element_type=jnp.float32) + g("bm2")
    h3, a = _mincut_pool(hf.reshape(BG, K1, HIDDEN), a, s.reshape(BG, K1, K2))

    # ---- level 3: conv3 -> ln3/relu ------------------------------------------
    h3 = _dense_graph_conv(h3, a, g("wconv3"), g("brel3"))
    hf = _layernorm_relu(h3.reshape(BG * K2, HIDDEN), g("g3"), g("be3"))

    # ---- head: lin1/relu -> readout1 -> mean over nodes -> sigmoid -----------
    hf = jnp.maximum(jnp.dot(hf, g("wl1"),
                             preferred_element_type=jnp.float32) + g("bl1"), 0.0)
    y = jnp.dot(hf, g("wro"), preferred_element_type=jnp.float32) + g("bro")
    cls = jnp.mean(y.reshape(BG, K2 * OUT_CH), axis=-1)             # [BG]
    out_ref[0, 0, :] = 1.0 / (1.0 + jnp.exp(-cls))                  # one row / step


# -------------------------------- wrapper -------------------------------------
def model_pool_ln_forward(x_dense, adj_dense, ea_dense, packed_params):
    # Layout prep in the wrapper (one-time XLA HBM ops, hidden by the pipeline):
    #   * adj transposed copy [B, N_dst, N_src] so the kernel never transposes.
    #   * edge attrs -> [B, E, N_dst, N_src] so in-kernel ea math is lane-dense.
    adj_t = jnp.swapaxes(adj_dense, -1, -2)
    ea_t = jnp.transpose(ea_dense, (0, 3, 2, 1))

    out = pl.pallas_call(
        model_kernel,
        out_shape=jax.ShapeDtypeStruct((NBLK, 1, BG), jnp.float32),
        grid_spec=pltpu.PrefetchScalarGridSpec(
            num_scalar_prefetch=0,
            grid=(NBLK,),
            in_specs=[
                pl.BlockSpec((BG, N, C_IN), lambda b: (b, 0, 0)),
                pl.BlockSpec((BG, N, N), lambda b: (b, 0, 0)),
                pl.BlockSpec((BG, N, N), lambda b: (b, 0, 0)),
                pl.BlockSpec((BG, EDGE_DIM, N, N), lambda b: (b, 0, 0, 0)),
                pl.BlockSpec((P_ROWS, P_LANE), lambda b: (0, 0)),  # grid-invariant
            ],
            out_specs=pl.BlockSpec((1, 1, BG), lambda b: (b, 0, 0)),
        ),
        compiler_params=pltpu.CompilerParams(
            dimension_semantics=("parallel",),
            vmem_limit_bytes=48 << 20,   # headroom for the real N≈384 config
        ),
    )(x_dense, adj_dense, adj_t, ea_t, packed_params)

    # class_1.squeeze(-1)  (OUT_CH == 1)
    return out.reshape(B)


# --------------------------------- main ----------------------------------------
if __name__ == "__main__":
    key = jax.random.PRNGKey(0)
    k_x, k_adj, k_ea, k_par = jax.random.split(key, 4)

    # dense-batched graph inputs (equivalent of x / edge_index / edge_attr /
    # batch after reshape + to_dense_batch + to_dense_adj; every graph has N nodes)
    x_dense = jax.random.normal(k_x, (B, N, C_IN), dtype=jnp.float32)
    adj_dense = (jax.random.uniform(k_adj, (B, N, N)) < 0.4).astype(jnp.float32)
    adj_dense = adj_dense * (1.0 - jnp.eye(N, dtype=jnp.float32))[None]  # no self-loops
    ea_dense = (jax.random.normal(k_ea, (B, N, N, EDGE_DIM), dtype=jnp.float32)
                * adj_dense[..., None])

    params = init_params(k_par)
    packed = pack_params(params)

    out = jax.jit(model_pool_ln_forward)(x_dense, adj_dense, ea_dense, packed)
    out = jax.block_until_ready(out)
    assert out.shape == (B,)
    print("KERNEL_OK")
</pallas_src>

<mosaic_0001>
module attributes {stable_mosaic.version = 11 : i64} {
  func.func @model_kernel(%arg0: i32, %arg1: memref<2x8x4xf32, #tpu.memory_space<vmem>>, %arg2: memref<2x8x8xf32, #tpu.memory_space<vmem>>, %arg3: memref<2x8x8xf32, #tpu.memory_space<vmem>>, %arg4: memref<2x5x8x8xf32, #tpu.memory_space<vmem>>, %arg5: memref<408x128xf32, #tpu.memory_space<vmem>>, %arg6: memref<1x1x2xf32, #tpu.memory_space<vmem>>) attributes {dimension_semantics = [#tpu.dimension_semantics<parallel>], iteration_bounds = array<i64: 2>, scalar_prefetch = 0 : i64, scratch_operands = 0 : i64, tpu.core_type = #tpu.core_type<tc>, window_params = [{transform_indices = @transform_0, window_bounds = array<i64: 2, 8, 4>}, {transform_indices = @transform_1, window_bounds = array<i64: 2, 8, 8>}, {transform_indices = @transform_2, window_bounds = array<i64: 2, 8, 8>}, {transform_indices = @transform_3, window_bounds = array<i64: 2, 5, 8, 8>}, {pipeline_mode = #tpu.pipeline_mode<synchronous>, transform_indices = @transform_4, window_bounds = array<i64: 408, 128>}, {transform_indices = @transform_5, window_bounds = array<i64: 1, 1, 2>}]} {
    %c0 = arith.constant 0 : index
    %c0_0 = arith.constant 0 : index
    %c0_1 = arith.constant 0 : index
    %0 = vector.load %arg1[%c0, %c0_0, %c0_1] : memref<2x8x4xf32, #tpu.memory_space<vmem>>, vector<2x8x4xf32>
    %c0_2 = arith.constant 0 : index
    %c0_3 = arith.constant 0 : index
    %c0_4 = arith.constant 0 : index
    %1 = vector.load %arg2[%c0_2, %c0_3, %c0_4] : memref<2x8x8xf32, #tpu.memory_space<vmem>>, vector<2x8x8xf32>
    %c0_5 = arith.constant 0 : index
    %c0_6 = arith.constant 0 : index
    %c0_7 = arith.constant 0 : index
    %2 = vector.load %arg3[%c0_5, %c0_6, %c0_7] : memref<2x8x8xf32, #tpu.memory_space<vmem>>, vector<2x8x8xf32>
    %c0_8 = arith.constant 0 : index
    %c0_9 = arith.constant 0 : index
    %c0_10 = arith.constant 0 : index
    %c0_11 = arith.constant 0 : index
    %3 = vector.load %arg4[%c0_8, %c0_9, %c0_10, %c0_11] : memref<2x5x8x8xf32, #tpu.memory_space<vmem>>, vector<2x5x8x8xf32>
    %4 = vector.shape_cast %0 : vector<2x8x4xf32> to vector<16x4xf32>
    %c0_12 = arith.constant 0 : index
    %c0_13 = arith.constant 0 : index
    %5 = vector.load %arg5[%c0_12, %c0_13] : memref<408x128xf32, #tpu.memory_space<vmem>>, vector<4x128xf32>
    %cst = arith.constant dense<0.000000e+00> : vector<16x128xf32>
    %6 = tpu.matmul %4, %5, %cst {dimension_numbers = #tpu.dot_dimension_numbers<[1], [0], [0], [1], [0, 0, 1, 1], [], []>} : vector<16x4xf32>, vector<4x128xf32>, vector<16x128xf32> -> vector<16x128xf32>
    %c8 = arith.constant 8 : index
    %c0_14 = arith.constant 0 : index
    %7 = vector.load %arg5[%c8, %c0_14] : memref<408x128xf32, #tpu.memory_space<vmem>>, vector<1x128xf32>
    %8 = vector.broadcast %7 : vector<1x128xf32> to vector<16x128xf32>
    %9 = arith.addf %6, %8 : vector<16x128xf32>
    %10 = vector.extract_strided_slice %9 {offsets = [0, 0], sizes = [16, 32], strides = [1, 1]} : vector<16x128xf32> to vector<16x32xf32>
    %11 = vector.extract_strided_slice %9 {offsets = [0, 32], sizes = [16, 32], strides = [1, 1]} : vector<16x128xf32> to vector<16x32xf32>
    %12 = vector.extract_strided_slice %9 {offsets = [0, 64], sizes = [16, 32], strides = [1, 1]} : vector<16x128xf32> to vector<16x32xf32>
    %13 = vector.extract_strided_slice %9 {offsets = [0, 96], sizes = [16, 32], strides = [1, 1]} : vector<16x128xf32> to vector<16x32xf32>
    %14 = vector.shape_cast %10 : vector<16x32xf32> to vector<2x8x32xf32>
    %15 = vector.shape_cast %11 : vector<16x32xf32> to vector<2x8x32xf32>
    %16 = vector.shape_cast %12 : vector<16x32xf32> to vector<2x8x32xf32>
    %c24 = arith.constant 24 : index
    %c0_15 = arith.constant 0 : index
    %17 = vector.load %arg5[%c24, %c0_15] : memref<408x128xf32, #tpu.memory_space<vmem>>, vector<32x5xf32>
    %cst_16 = arith.constant dense<0.000000e+00> : vector<16x5xf32>
    %18 = tpu.matmul %10, %17, %cst_16 {dimension_numbers = #tpu.dot_dimension_numbers<[1], [0], [0], [1], [0, 0, 1, 1], [], []>} : vector<16x32xf32>, vector<32x5xf32>, vector<16x5xf32> -> vector<16x5xf32>
    %19 = vector.shape_cast %18 : vector<16x5xf32> to vector<2x8x5xf32>
    %cst_17 = arith.constant 0.000000e+00 : f32
    %20 = vector.broadcast %cst_17 : f32 to vector<2x8x8xf32>
    %21 = vector.extract_strided_slice %3 {offsets = [0, 0, 0, 0], sizes = [2, 1, 8, 8], strides = [1, 1, 1, 1]} : vector<2x5x8x8xf32> to vector<2x1x8x8xf32>
    %22 = vector.shape_cast %21 : vector<2x1x8x8xf32> to vector<2x8x8xf32>
    %23 = vector.extract_strided_slice %19 {offsets = [0, 0, 0], sizes = [2, 8, 1], strides = [1, 1, 1]} : vector<2x8x5xf32> to vector<2x8x1xf32>
    %24 = vector.broadcast %23 : vector<2x8x1xf32> to vector<2x8x8xf32>
    %25 = arith.mulf %22, %24 : vector<2x8x8xf32>
    %26 = arith.addf %20, %25 : vector<2x8x8xf32>
    %27 = vector.extract_strided_slice %3 {offsets = [0, 1, 0, 0], sizes = [2, 1, 8, 8], strides = [1, 1, 1, 1]} : vector<2x5x8x8xf32> to vector<2x1x8x8xf32>
    %28 = vector.shape_cast %27 : vector<2x1x8x8xf32> to vector<2x8x8xf32>
    %29 = vector.extract_strided_slice %19 {offsets = [0, 0, 1], sizes = [2, 8, 1], strides = [1, 1, 1]} : vector<2x8x5xf32> to vector<2x8x1xf32>
    %30 = vector.broadcast %29 : vector<2x8x1xf32> to vector<2x8x8xf32>
    %31 = arith.mulf %28, %30 : vector<2x8x8xf32>
    %32 = arith.addf %26, %31 : vector<2x8x8xf32>
    %33 = vector.extract_strided_slice %3 {offsets = [0, 2, 0, 0], sizes = [2, 1, 8, 8], strides = [1, 1, 1, 1]} : vector<2x5x8x8xf32> to vector<2x1x8x8xf32>
    %34 = vector.shape_cast %33 : vector<2x1x8x8xf32> to vector<2x8x8xf32>
    %35 = vector.extract_strided_slice %19 {offsets = [0, 0, 2], sizes = [2, 8, 1], strides = [1, 1, 1]} : vector<2x8x5xf32> to vector<2x8x1xf32>
    %36 = vector.broadcast %35 : vector<2x8x1xf32> to vector<2x8x8xf32>
    %37 = arith.mulf %34, %36 : vector<2x8x8xf32>
    %38 = arith.addf %32, %37 : vector<2x8x8xf32>
    %39 = vector.extract_strided_slice %3 {offsets = [0, 3, 0, 0], sizes = [2, 1, 8, 8], strides = [1, 1, 1, 1]} : vector<2x5x8x8xf32> to vector<2x1x8x8xf32>
    %40 = vector.shape_cast %39 : vector<2x1x8x8xf32> to vector<2x8x8xf32>
    %41 = vector.extract_strided_slice %19 {offsets = [0, 0, 3], sizes = [2, 8, 1], strides = [1, 1, 1]} : vector<2x8x5xf32> to vector<2x8x1xf32>
    %42 = vector.broadcast %41 : vector<2x8x1xf32> to vector<2x8x8xf32>
    %43 = arith.mulf %40, %42 : vector<2x8x8xf32>
    %44 = arith.addf %38, %43 : vector<2x8x8xf32>
    %45 = vector.extract_strided_slice %3 {offsets = [0, 4, 0, 0], sizes = [2, 1, 8, 8], strides = [1, 1, 1, 1]} : vector<2x5x8x8xf32> to vector<2x1x8x8xf32>
    %46 = vector.shape_cast %45 : vector<2x1x8x8xf32> to vector<2x8x8xf32>
    %47 = vector.extract_strided_slice %19 {offsets = [0, 0, 4], sizes = [2, 8, 1], strides = [1, 1, 1]} : vector<2x8x5xf32> to vector<2x8x1xf32>
    %48 = vector.broadcast %47 : vector<2x8x1xf32> to vector<2x8x8xf32>
    %49 = arith.mulf %46, %48 : vector<2x8x8xf32>
    %50 = arith.addf %44, %49 : vector<2x8x8xf32>
    "tpu.trace_start"() <{level = 10 : i32, message = "bdh,bsh->bds"}> : () -> ()
    %cst_18 = arith.constant dense<0.000000e+00> : vector<2x8x8xf32>
    %51 = tpu.matmul %14, %15, %cst_18 {dimension_numbers = #tpu.dot_dimension_numbers<[2], [2], [1], [1], [0, 0, 0, 1, 1, 1], [0], [0]>} : vector<2x8x32xf32>, vector<2x8x32xf32>, vector<2x8x8xf32> -> vector<2x8x8xf32>
    "tpu.trace_stop"() : () -> ()
    %52 = arith.addf %51, %50 : vector<2x8x8xf32>
    %cst_19 = arith.constant 0.000000e+00 : f32
    %53 = vector.broadcast %cst_19 : f32 to vector<2x8x8xf32>
    %54 = arith.cmpf ogt, %2, %53 : vector<2x8x8xf32>
    %cst_20 = arith.constant -1.000000e+30 : f32
    %55 = vector.broadcast %cst_20 : f32 to vector<2x8x8xf32>
    %56 = arith.select %54, %52, %55 : vector<2x8x8xi1>, vector<2x8x8xf32>
    %cst_21 = arith.constant dense<0xFF800000> : vector<2x8xf32>
    %57 = vector.multi_reduction <maximumf>, %56, %cst_21 [2] : vector<2x8x8xf32> to vector<2x8xf32>
    %58 = vector.shape_cast %57 : vector<2x8xf32> to vector<2x8x1xf32>
    %59 = vector.broadcast %58 : vector<2x8x1xf32> to vector<2x8x8xf32>
    %60 = arith.subf %56, %59 : vector<2x8x8xf32>
    %61 = math.exp %60 : vector<2x8x8xf32>
    %cst_22 = arith.constant 0.000000e+00 : f32
    %62 = vector.broadcast %cst_22 : f32 to vector<2x8x8xf32>
    %63 = arith.select %54, %61, %62 : vector<2x8x8xi1>, vector<2x8x8xf32>
    %cst_23 = arith.constant dense<0.000000e+00> : vector<2x8xf32>
    %64 = vector.multi_reduction <add>, %63, %cst_23 [2] : vector<2x8x8xf32> to vector<2x8xf32>
    %65 = vector.shape_cast %64 : vector<2x8xf32> to vector<2x8x1xf32>
    %cst_24 = arith.constant 0.000000e+00 : f32
    %66 = vector.broadcast %cst_24 : f32 to vector<2x8x1xf32>
    %67 = arith.cmpf oeq, %65, %66 : vector<2x8x1xf32>
    %cst_25 = arith.constant 1.000000e+00 : f32
    %68 = vector.broadcast %cst_25 : f32 to vector<2x8x1xf32>
    %69 = arith.select %67, %68, %65 : vector<2x8x1xi1>, vector<2x8x1xf32>
    %70 = tpu.reciprocal %69 {approx = true} : vector<2x8x1xf32> -> vector<2x8x1xf32>
    %71 = vector.broadcast %70 : vector<2x8x1xf32> to vector<2x8x8xf32>
    %72 = arith.mulf %63, %71 : vector<2x8x8xf32>
    "tpu.trace_start"() <{level = 10 : i32, message = "bds,bsh->bdh"}> : () -> ()
    %cst_26 = arith.constant dense<0.000000e+00> : vector<2x8x32xf32>
    %73 = tpu.matmul %72, %16, %cst_26 {dimension_numbers = #tpu.dot_dimension_numbers<[2], [1], [1], [2], [0, 0, 0, 1, 1, 2], [0], [0]>} : vector<2x8x8xf32>, vector<2x8x32xf32>, vector<2x8x32xf32> -> vector<2x8x32xf32>
    "tpu.trace_stop"() : () -> ()
    %74 = vector.extract_strided_slice %3 {offsets = [0, 0, 0, 0], sizes = [2, 1, 8, 8], strides = [1, 1, 1, 1]} : vector<2x5x8x8xf32> to vector<2x1x8x8xf32>
    %75 = vector.shape_cast %74 : vector<2x1x8x8xf32> to vector<2x8x8xf32>
    %76 = arith.mulf %72, %75 : vector<2x8x8xf32>
    %cst_27 = arith.constant dense<0.000000e+00> : vector<2x8xf32>
    %77 = vector.multi_reduction <add>, %76, %cst_27 [2] : vector<2x8x8xf32> to vector<2x8xf32>
    %78 = vector.shape_cast %77 : vector<2x8xf32> to vector<2x8x1xf32>
    %79 = vector.extract_strided_slice %3 {offsets = [0, 1, 0, 0], sizes = [2, 1, 8, 8], strides = [1, 1, 1, 1]} : vector<2x5x8x8xf32> to vector<2x1x8x8xf32>
    %80 = vector.shape_cast %79 : vector<2x1x8x8xf32> to vector<2x8x8xf32>
    %81 = arith.mulf %72, %80 : vector<2x8x8xf32>
    %cst_28 = arith.constant dense<0.000000e+00> : vector<2x8xf32>
    %82 = vector.multi_reduction <add>, %81, %cst_28 [2] : vector<2x8x8xf32> to vector<2x8xf32>
    %83 = vector.shape_cast %82 : vector<2x8xf32> to vector<2x8x1xf32>
    %84 = vector.extract_strided_slice %3 {offsets = [0, 2, 0, 0], sizes = [2, 1, 8, 8], strides = [1, 1, 1, 1]} : vector<2x5x8x8xf32> to vector<2x1x8x8xf32>
    %85 = vector.shape_cast %84 : vector<2x1x8x8xf32> to vector<2x8x8xf32>
    %86 = arith.mulf %72, %85 : vector<2x8x8xf32>
    %cst_29 = arith.constant dense<0.000000e+00> : vector<2x8xf32>
    %87 = vector.multi_reduction <add>, %86, %cst_29 [2] : vector<2x8x8xf32> to vector<2x8xf32>
    %88 = vector.shape_cast %87 : vector<2x8xf32> to vector<2x8x1xf32>
    %89 = vector.extract_strided_slice %3 {offsets = [0, 3, 0, 0], sizes = [2, 1, 8, 8], strides = [1, 1, 1, 1]} : vector<2x5x8x8xf32> to vector<2x1x8x8xf32>
    %90 = vector.shape_cast %89 : vector<2x1x8x8xf32> to vector<2x8x8xf32>
    %91 = arith.mulf %72, %90 : vector<2x8x8xf32>
    %cst_30 = arith.constant dense<0.000000e+00> : vector<2x8xf32>
    %92 = vector.multi_reduction <add>, %91, %cst_30 [2] : vector<2x8x8xf32> to vector<2x8xf32>
    %93 = vector.shape_cast %92 : vector<2x8xf32> to vector<2x8x1xf32>
    %94 = vector.extract_strided_slice %3 {offsets = [0, 4, 0, 0], sizes = [2, 1, 8, 8], strides = [1, 1, 1, 1]} : vector<2x5x8x8xf32> to vector<2x1x8x8xf32>
    %95 = vector.shape_cast %94 : vector<2x1x8x8xf32> to vector<2x8x8xf32>
    %96 = arith.mulf %72, %95 : vector<2x8x8xf32>
    %cst_31 = arith.constant dense<0.000000e+00> : vector<2x8xf32>
    %97 = vector.multi_reduction <add>, %96, %cst_31 [2] : vector<2x8x8xf32> to vector<2x8xf32>
    %98 = vector.shape_cast %97 : vector<2x8xf32> to vector<2x8x1xf32>
    %99 = tpu.concatenate %78, %83, %88, %93, %98 in 2 : vector<2x8x1xf32>, vector<2x8x1xf32>, vector<2x8x1xf32>, vector<2x8x1xf32>, vector<2x8x1xf32> -> vector<2x8x5xf32>
    %100 = vector.shape_cast %99 : vector<2x8x5xf32> to vector<16x5xf32>
    %c16 = arith.constant 16 : index
    %c0_32 = arith.constant 0 : index
    %101 = vector.load %arg5[%c16, %c0_32] : memref<408x128xf32, #tpu.memory_space<vmem>>, vector<5x32xf32>
    %cst_33 = arith.constant dense<0.000000e+00> : vector<16x32xf32>
    %102 = tpu.matmul %100, %101, %cst_33 {dimension_numbers = #tpu.dot_dimension_numbers<[1], [0], [0], [1], [0, 0, 1, 1], [], []>} : vector<16x5xf32>, vector<5x32xf32>, vector<16x32xf32> -> vector<16x32xf32>
    %103 = vector.shape_cast %73 : vector<2x8x32xf32> to vector<16x32xf32>
    %104 = arith.addf %103, %102 : vector<16x32xf32>
    %105 = arith.addf %104, %13 : vector<16x32xf32>
    %c56 = arith.constant 56 : index
    %c0_34 = arith.constant 0 : index
    %106 = vector.load %arg5[%c56, %c0_34] : memref<408x128xf32, #tpu.memory_space<vmem>>, vector<1x32xf32>
    %c64 = arith.constant 64 : index
    %c0_35 = arith.constant 0 : index
    %107 = vector.load %arg5[%c64, %c0_35] : memref<408x128xf32, #tpu.memory_space<vmem>>, vector<1x32xf32>
    %cst_36 = arith.constant dense<0.000000e+00> : vector<16xf32>
    %108 = vector.multi_reduction <add>, %105, %cst_36 [1] : vector<16x32xf32> to vector<16xf32>
    %109 = vector.shape_cast %108 : vector<16xf32> to vector<16x1xf32>
    %cst_37 = arith.constant 3.200000e+01 : f32
    %110 = vector.broadcast %cst_37 : f32 to vector<16x1xf32>
    %111 = arith.divf %109, %110 : vector<16x1xf32>
    %112 = vector.broadcast %111 : vector<16x1xf32> to vector<16x32xf32>
    %113 = arith.subf %105, %112 : vector<16x32xf32>
    %114 = arith.mulf %113, %113 : vector<16x32xf32>
    %cst_38 = arith.constant dense<0.000000e+00> : vector<16xf32>
    %115 = vector.multi_reduction <add>, %114, %cst_38 [1] : vector<16x32xf32> to vector<16xf32>
    %116 = vector.shape_cast %115 : vector<16xf32> to vector<16x1xf32>
    %cst_39 = arith.constant 3.200000e+01 : f32
    %117 = vector.broadcast %cst_39 : f32 to vector<16x1xf32>
    %118 = arith.divf %116, %117 : vector<16x1xf32>
    %119 = vector.broadcast %111 : vector<16x1xf32> to vector<16x32xf32>
    %120 = arith.subf %105, %119 : vector<16x32xf32>
    %cst_40 = arith.constant 9.99999974E-6 : f32
    %121 = vector.broadcast %cst_40 : f32 to vector<16x1xf32>
    %122 = arith.addf %118, %121 : vector<16x1xf32>
    %123 = math.rsqrt %122 : vector<16x1xf32>
    %124 = vector.broadcast %123 : vector<16x1xf32> to vector<16x32xf32>
    %125 = arith.mulf %120, %124 : vector<16x32xf32>
    %126 = vector.broadcast %106 : vector<1x32xf32> to vector<16x32xf32>
    %127 = arith.mulf %125, %126 : vector<16x32xf32>
    %128 = vector.broadcast %107 : vector<1x32xf32> to vector<16x32xf32>
    %129 = arith.addf %127, %128 : vector<16x32xf32>
    %cst_41 = arith.constant 0.000000e+00 : f32
    %130 = vector.broadcast %cst_41 : f32 to vector<16x32xf32>
    %131 = arith.maximumf %129, %130 : vector<16x32xf32>
    %c72 = arith.constant 72 : index
    %c0_42 = arith.constant 0 : index
    %132 = vector.load %arg5[%c72, %c0_42] : memref<408x128xf32, #tpu.memory_space<vmem>>, vector<32x4xf32>
    %cst_43 = arith.constant dense<0.000000e+00> : vector<16x4xf32>
    %133 = tpu.matmul %131, %132, %cst_43 {dimension_numbers = #tpu.dot_dimension_numbers<[1], [0], [0], [1], [0, 0, 1, 1], [], []>} : vector<16x32xf32>, vector<32x4xf32>, vector<16x4xf32> -> vector<16x4xf32>
    %c104 = arith.constant 104 : index
    %c0_44 = arith.constant 0 : index
    %134 = vector.load %arg5[%c104, %c0_44] : memref<408x128xf32, #tpu.memory_space<vmem>>, vector<1x4xf32>
    %135 = vector.broadcast %134 : vector<1x4xf32> to vector<16x4xf32>
    %136 = arith.addf %133, %135 : vector<16x4xf32>
    %137 = vector.shape_cast %131 : vector<16x32xf32> to vector<2x8x32xf32>
    %138 = vector.shape_cast %136 : vector<16x4xf32> to vector<2x8x4xf32>
    %cst_45 = arith.constant dense<0xFF800000> : vector<2x8xf32>
    %139 = vector.multi_reduction <maximumf>, %138, %cst_45 [2] : vector<2x8x4xf32> to vector<2x8xf32>
    %140 = vector.shape_cast %139 : vector<2x8xf32> to vector<2x8x1xf32>
    %141 = vector.broadcast %140 : vector<2x8x1xf32> to vector<2x8x4xf32>
    %142 = arith.subf %138, %141 : vector<2x8x4xf32>
    %143 = math.exp %142 : vector<2x8x4xf32>
    %cst_46 = arith.constant dense<0.000000e+00> : vector<2x8xf32>
    %144 = vector.multi_reduction <add>, %143, %cst_46 [2] : vector<2x8x4xf32> to vector<2x8xf32>
    %145 = vector.shape_cast %144 : vector<2x8xf32> to vector<2x8x1xf32>
    %146 = tpu.reciprocal %145 {approx = true} : vector<2x8x1xf32> -> vector<2x8x1xf32>
    %147 = vector.broadcast %146 : vector<2x8x1xf32> to vector<2x8x4xf32>
    %148 = arith.mulf %143, %147 : vector<2x8x4xf32>
    "tpu.trace_start"() <{level = 10 : i32, message = "bnk,bnh->bkh"}> : () -> ()
    %cst_47 = arith.constant dense<0.000000e+00> : vector<2x4x32xf32>
    %149 = tpu.matmul %148, %137, %cst_47 {dimension_numbers = #tpu.dot_dimension_numbers<[1], [1], [2], [2], [0, 0, 0, 2, 1, 2], [0], [0]>} : vector<2x8x4xf32>, vector<2x8x32xf32>, vector<2x4x32xf32> -> vector<2x4x32xf32>
    "tpu.trace_stop"() : () -> ()
    "tpu.trace_start"() <{level = 10 : i32, message = "bnk,bnm->bkm"}> : () -> ()
    %cst_48 = arith.constant dense<0.000000e+00> : vector<2x4x8xf32>
    %150 = tpu.matmul %148, %1, %cst_48 {dimension_numbers = #tpu.dot_dimension_numbers<[1], [1], [2], [2], [0, 0, 0, 2, 1, 2], [0], [0]>} : vector<2x8x4xf32>, vector<2x8x8xf32>, vector<2x4x8xf32> -> vector<2x4x8xf32>
    "tpu.trace_stop"() : () -> ()
    "tpu.trace_start"() <{level = 10 : i32, message = "bkm,bmj->bkj"}> : () -> ()
    %cst_49 = arith.constant dense<0.000000e+00> : vector<2x4x4xf32>
    %151 = tpu.matmul %150, %148, %cst_49 {dimension_numbers = #tpu.dot_dimension_numbers<[2], [1], [1], [2], [0, 0, 0, 1, 1, 2], [0], [0]>} : vector<2x4x8xf32>, vector<2x8x4xf32>, vector<2x4x4xf32> -> vector<2x4x4xf32>
    "tpu.trace_stop"() : () -> ()
    %152 = tpu.iota {dimensions = array<i32: 0>} : vector<4x4xi32>
    %153 = tpu.iota {dimensions = array<i32: 1>} : vector<4x4xi32>
    %154 = arith.cmpi eq, %152, %153 : vector<4x4xi32>
    %155 = vector.shape_cast %154 : vector<4x4xi1> to vector<1x4x4xi1>
    %cst_50 = arith.constant 0.000000e+00 : f32
    %156 = vector.shape_cast %155 : vector<1x4x4xi1> to vector<1x4x4xi1>
    %157 = vector.broadcast %156 : vector<1x4x4xi1> to vector<2x4x4xi1>
    %158 = vector.broadcast %cst_50 : f32 to vector<2x4x4xf32>
    %159 = arith.select %157, %158, %151 : vector<2x4x4xi1>, vector<2x4x4xf32>
    %cst_51 = arith.constant dense<0.000000e+00> : vector<2x4xf32>
    %160 = vector.multi_reduction <add>, %159, %cst_51 [2] : vector<2x4x4xf32> to vector<2x4xf32>
    %161 = vector.shape_cast %160 : vector<2x4xf32> to vector<2x4x1xf32>
    %162 = math.sqrt %161 : vector<2x4x1xf32>
    %cst_52 = arith.constant 1.000000e-15 : f32
    %163 = vector.broadcast %cst_52 : f32 to vector<2x4x1xf32>
    %164 = arith.addf %162, %163 : vector<2x4x1xf32>
    %165 = tpu.reciprocal %164 {approx = true} : vector<2x4x1xf32> -> vector<2x4x1xf32>
    %166 = vector.broadcast %165 : vector<2x4x1xf32> to vector<2x4x4xf32>
    %167 = arith.mulf %159, %166 : vector<2x4x4xf32>
    %168 = tpu.transpose %165, [0, 2, 1] : vector<2x4x1xf32> -> vector<2x1x4xf32>
    %169 = vector.broadcast %168 : vector<2x1x4xf32> to vector<2x4x4xf32>
    %170 = arith.mulf %167, %169 : vector<2x4x4xf32>
    %c112 = arith.constant 112 : index
    %c0_53 = arith.constant 0 : index
    %171 = vector.load %arg5[%c112, %c0_53] : memref<408x128xf32, #tpu.memory_space<vmem>>, vector<64x32xf32>
    %c176 = arith.constant 176 : index
    %c0_54 = arith.constant 0 : index
    %172 = vector.load %arg5[%c176, %c0_54] : memref<408x128xf32, #tpu.memory_space<vmem>>, vector<1x32xf32>
    "tpu.trace_start"() <{level = 10 : i32, message = "bnm,bmh->bnh"}> : () -> ()
    %cst_55 = arith.constant dense<0.000000e+00> : vector<2x4x32xf32>
    %173 = tpu.matmul %170, %149, %cst_55 {dimension_numbers = #tpu.dot_dimension_numbers<[2], [1], [1], [2], [0, 0, 0, 1, 1, 2], [0], [0]>} : vector<2x4x4xf32>, vector<2x4x32xf32>, vector<2x4x32xf32> -> vector<2x4x32xf32>
    "tpu.trace_stop"() : () -> ()
    %174 = tpu.concatenate %173, %149 in 2 : vector<2x4x32xf32>, vector<2x4x32xf32> -> vector<2x4x64xf32>
    %175 = vector.shape_cast %174 : vector<2x4x64xf32> to vector<8x64xf32>
    %cst_56 = arith.constant dense<0.000000e+00> : vector<8x32xf32>
    %176 = tpu.matmul %175, %171, %cst_56 {dimension_numbers = #tpu.dot_dimension_numbers<[1], [0], [0], [1], [0, 0, 1, 1], [], []>} : vector<8x64xf32>, vector<64x32xf32>, vector<8x32xf32> -> vector<8x32xf32>
    %177 = vector.broadcast %172 : vector<1x32xf32> to vector<8x32xf32>
    %178 = arith.addf %176, %177 : vector<8x32xf32>
    %179 = vector.shape_cast %178 : vector<8x32xf32> to vector<2x4x32xf32>
    %180 = vector.shape_cast %179 : vector<2x4x32xf32> to vector<8x32xf32>
    %c184 = arith.constant 184 : index
    %c0_57 = arith.constant 0 : index
    %181 = vector.load %arg5[%c184, %c0_57] : memref<408x128xf32, #tpu.memory_space<vmem>>, vector<1x32xf32>
    %c192 = arith.constant 192 : index
    %c0_58 = arith.constant 0 : index
    %182 = vector.load %arg5[%c192, %c0_58] : memref<408x128xf32, #tpu.memory_space<vmem>>, vector<1x32xf32>
    %cst_59 = arith.constant dense<0.000000e+00> : vector<8xf32>
    %183 = vector.multi_reduction <add>, %180, %cst_59 [1] : vector<8x32xf32> to vector<8xf32>
    %184 = vector.shape_cast %183 : vector<8xf32> to vector<8x1xf32>
    %cst_60 = arith.constant 3.200000e+01 : f32
    %185 = vector.broadcast %cst_60 : f32 to vector<8x1xf32>
    %186 = arith.divf %184, %185 : vector<8x1xf32>
    %187 = vector.broadcast %186 : vector<8x1xf32> to vector<8x32xf32>
    %188 = arith.subf %180, %187 : vector<8x32xf32>
    %189 = arith.mulf %188, %188 : vector<8x32xf32>
    %cst_61 = arith.constant dense<0.000000e+00> : vector<8xf32>
    %190 = vector.multi_reduction <add>, %189, %cst_61 [1] : vector<8x32xf32> to vector<8xf32>
    %191 = vector.shape_cast %190 : vector<8xf32> to vector<8x1xf32>
    %cst_62 = arith.constant 3.200000e+01 : f32
    %192 = vector.broadcast %cst_62 : f32 to vector<8x1xf32>
    %193 = arith.divf %191, %192 : vector<8x1xf32>
    %194 = vector.broadcast %186 : vector<8x1xf32> to vector<8x32xf32>
    %195 = arith.subf %180, %194 : vector<8x32xf32>
    %cst_63 = arith.constant 9.99999974E-6 : f32
    %196 = vector.broadcast %cst_63 : f32 to vector<8x1xf32>
    %197 = arith.addf %193, %196 : vector<8x1xf32>
    %198 = math.rsqrt %197 : vector<8x1xf32>
    %199 = vector.broadcast %198 : vector<8x1xf32> to vector<8x32xf32>
    %200 = arith.mulf %195, %199 : vector<8x32xf32>
    %201 = vector.broadcast %181 : vector<1x32xf32> to vector<8x32xf32>
    %202 = arith.mulf %200, %201 : vector<8x32xf32>
    %203 = vector.broadcast %182 : vector<1x32xf32> to vector<8x32xf32>
    %204 = arith.addf %202, %203 : vector<8x32xf32>
    %cst_64 = arith.constant 0.000000e+00 : f32
    %205 = vector.broadcast %cst_64 : f32 to vector<8x32xf32>
    %206 = arith.maximumf %204, %205 : vector<8x32xf32>
    %c200 = arith.constant 200 : index
    %c0_65 = arith.constant 0 : index
    %207 = vector.load %arg5[%c200, %c0_65] : memref<408x128xf32, #tpu.memory_space<vmem>>, vector<32x2xf32>
    %cst_66 = arith.constant dense<0.000000e+00> : vector<8x2xf32>
    %208 = tpu.matmul %206, %207, %cst_66 {dimension_numbers = #tpu.dot_dimension_numbers<[1], [0], [0], [1], [0, 0, 1, 1], [], []>} : vector<8x32xf32>, vector<32x2xf32>, vector<8x2xf32> -> vector<8x2xf32>
    %c232 = arith.constant 232 : index
    %c0_67 = arith.constant 0 : index
    %209 = vector.load %arg5[%c232, %c0_67] : memref<408x128xf32, #tpu.memory_space<vmem>>, vector<1x2xf32>
    %210 = vector.broadcast %209 : vector<1x2xf32> to vector<8x2xf32>
    %211 = arith.addf %208, %210 : vector<8x2xf32>
    %212 = vector.shape_cast %206 : vector<8x32xf32> to vector<2x4x32xf32>
    %213 = vector.shape_cast %211 : vector<8x2xf32> to vector<2x4x2xf32>
    %cst_68 = arith.constant dense<0xFF800000> : vector<2x4xf32>
    %214 = vector.multi_reduction <maximumf>, %213, %cst_68 [2] : vector<2x4x2xf32> to vector<2x4xf32>
    %215 = vector.shape_cast %214 : vector<2x4xf32> to vector<2x4x1xf32>
    %216 = vector.broadcast %215 : vector<2x4x1xf32> to vector<2x4x2xf32>
    %217 = arith.subf %213, %216 : vector<2x4x2xf32>
    %218 = math.exp %217 : vector<2x4x2xf32>
    %cst_69 = arith.constant dense<0.000000e+00> : vector<2x4xf32>
    %219 = vector.multi_reduction <add>, %218, %cst_69 [2] : vector<2x4x2xf32> to vector<2x4xf32>
    %220 = vector.shape_cast %219 : vector<2x4xf32> to vector<2x4x1xf32>
    %221 = tpu.reciprocal %220 {approx = true} : vector<2x4x1xf32> -> vector<2x4x1xf32>
    %222 = vector.broadcast %221 : vector<2x4x1xf32> to vector<2x4x2xf32>
    %223 = arith.mulf %218, %222 : vector<2x4x2xf32>
    "tpu.trace_start"() <{level = 10 : i32, message = "bnk,bnh->bkh"}> : () -> ()
    %cst_70 = arith.constant dense<0.000000e+00> : vector<2x2x32xf32>
    %224 = tpu.matmul %223, %212, %cst_70 {dimension_numbers = #tpu.dot_dimension_numbers<[1], [1], [2], [2], [0, 0, 0, 2, 1, 2], [0], [0]>} : vector<2x4x2xf32>, vector<2x4x32xf32>, vector<2x2x32xf32> -> vector<2x2x32xf32>
    "tpu.trace_stop"() : () -> ()
    "tpu.trace_start"() <{level = 10 : i32, message = "bnk,bnm->bkm"}> : () -> ()
    %cst_71 = arith.constant dense<0.000000e+00> : vector<2x2x4xf32>
    %225 = tpu.matmul %223, %170, %cst_71 {dimension_numbers = #tpu.dot_dimension_numbers<[1], [1], [2], [2], [0, 0, 0, 2, 1, 2], [0], [0]>} : vector<2x4x2xf32>, vector<2x4x4xf32>, vector<2x2x4xf32> -> vector<2x2x4xf32>
    "tpu.trace_stop"() : () -> ()
    "tpu.trace_start"() <{level = 10 : i32, message = "bkm,bmj->bkj"}> : () -> ()
    %cst_72 = arith.constant dense<0.000000e+00> : vector<2x2x2xf32>
    %226 = tpu.matmul %225, %223, %cst_72 {dimension_numbers = #tpu.dot_dimension_numbers<[2], [1], [1], [2], [0, 0, 0, 1, 1, 2], [0], [0]>} : vector<2x2x4xf32>, vector<2x4x2xf32>, vector<2x2x2xf32> -> vector<2x2x2xf32>
    "tpu.trace_stop"() : () -> ()
    %227 = tpu.iota {dimensions = array<i32: 0>} : vector<2x2xi32>
    %228 = tpu.iota {dimensions = array<i32: 1>} : vector<2x2xi32>
    %229 = arith.cmpi eq, %227, %228 : vector<2x2xi32>
    %230 = vector.shape_cast %229 : vector<2x2xi1> to vector<1x2x2xi1>
    %cst_73 = arith.constant 0.000000e+00 : f32
    %231 = vector.shape_cast %230 : vector<1x2x2xi1> to vector<1x2x2xi1>
    %232 = vector.broadcast %231 : vector<1x2x2xi1> to vector<2x2x2xi1>
    %233 = vector.broadcast %cst_73 : f32 to vector<2x2x2xf32>
    %234 = arith.select %232, %233, %226 : vector<2x2x2xi1>, vector<2x2x2xf32>
    %cst_74 = arith.constant dense<0.000000e+00> : vector<2x2xf32>
    %235 = vector.multi_reduction <add>, %234, %cst_74 [2] : vector<2x2x2xf32> to vector<2x2xf32>
    %236 = vector.shape_cast %235 : vector<2x2xf32> to vector<2x2x1xf32>
    %237 = math.sqrt %236 : vector<2x2x1xf32>
    %cst_75 = arith.constant 1.000000e-15 : f32
    %238 = vector.broadcast %cst_75 : f32 to vector<2x2x1xf32>
    %239 = arith.addf %237, %238 : vector<2x2x1xf32>
    %240 = tpu.reciprocal %239 {approx = true} : vector<2x2x1xf32> -> vector<2x2x1xf32>
    %241 = vector.broadcast %240 : vector<2x2x1xf32> to vector<2x2x2xf32>
    %242 = arith.mulf %234, %241 : vector<2x2x2xf32>
    %243 = tpu.transpose %240, [0, 2, 1] : vector<2x2x1xf32> -> vector<2x1x2xf32>
    %244 = vector.broadcast %243 : vector<2x1x2xf32> to vector<2x2x2xf32>
    %245 = arith.mulf %242, %244 : vector<2x2x2xf32>
    %c240 = arith.constant 240 : index
    %c0_76 = arith.constant 0 : index
    %246 = vector.load %arg5[%c240, %c0_76] : memref<408x128xf32, #tpu.memory_space<vmem>>, vector<64x32xf32>
    %c304 = arith.constant 304 : index
    %c0_77 = arith.constant 0 : index
    %247 = vector.load %arg5[%c304, %c0_77] : memref<408x128xf32, #tpu.memory_space<vmem>>, vector<1x32xf32>
    "tpu.trace_start"() <{level = 10 : i32, message = "bnm,bmh->bnh"}> : () -> ()
    %cst_78 = arith.constant dense<0.000000e+00> : vector<2x2x32xf32>
    %248 = tpu.matmul %245, %224, %cst_78 {dimension_numbers = #tpu.dot_dimension_numbers<[2], [1], [1], [2], [0, 0, 0, 1, 1, 2], [0], [0]>} : vector<2x2x2xf32>, vector<2x2x32xf32>, vector<2x2x32xf32> -> vector<2x2x32xf32>
    "tpu.trace_stop"() : () -> ()
    %249 = tpu.concatenate %248, %224 in 2 : vector<2x2x32xf32>, vector<2x2x32xf32> -> vector<2x2x64xf32>
    %250 = vector.shape_cast %249 : vector<2x2x64xf32> to vector<4x64xf32>
    %cst_79 = arith.constant dense<0.000000e+00> : vector<4x32xf32>
    %251 = tpu.matmul %250, %246, %cst_79 {dimension_numbers = #tpu.dot_dimension_numbers<[1], [0], [0], [1], [0, 0, 1, 1], [], []>} : vector<4x64xf32>, vector<64x32xf32>, vector<4x32xf32> -> vector<4x32xf32>
    %252 = vector.broadcast %247 : vector<1x32xf32> to vector<4x32xf32>
    %253 = arith.addf %251, %252 : vector<4x32xf32>
    %254 = vector.shape_cast %253 : vector<4x32xf32> to vector<2x2x32xf32>
    %255 = vector.shape_cast %254 : vector<2x2x32xf32> to vector<4x32xf32>
    %c312 = arith.constant 312 : index
    %c0_80 = arith.constant 0 : index
    %256 = vector.load %arg5[%c312, %c0_80] : memref<408x128xf32, #tpu.memory_space<vmem>>, vector<1x32xf32>
    %c320 = arith.constant 320 : index
    %c0_81 = arith.constant 0 : index
    %257 = vector.load %arg5[%c320, %c0_81] : memref<408x128xf32, #tpu.memory_space<vmem>>, vector<1x32xf32>
    %cst_82 = arith.constant dense<0.000000e+00> : vector<4xf32>
    %258 = vector.multi_reduction <add>, %255, %cst_82 [1] : vector<4x32xf32> to vector<4xf32>
    %259 = vector.shape_cast %258 : vector<4xf32> to vector<4x1xf32>
    %cst_83 = arith.constant 3.200000e+01 : f32
    %260 = vector.broadcast %cst_83 : f32 to vector<4x1xf32>
    %261 = arith.divf %259, %260 : vector<4x1xf32>
    %262 = vector.broadcast %261 : vector<4x1xf32> to vector<4x32xf32>
    %263 = arith.subf %255, %262 : vector<4x32xf32>
    %264 = arith.mulf %263, %263 : vector<4x32xf32>
    %cst_84 = arith.constant dense<0.000000e+00> : vector<4xf32>
    %265 = vector.multi_reduction <add>, %264, %cst_84 [1] : vector<4x32xf32> to vector<4xf32>
    %266 = vector.shape_cast %265 : vector<4xf32> to vector<4x1xf32>
    %cst_85 = arith.constant 3.200000e+01 : f32
    %267 = vector.broadcast %cst_85 : f32 to vector<4x1xf32>
    %268 = arith.divf %266, %267 : vector<4x1xf32>
    %269 = vector.broadcast %261 : vector<4x1xf32> to vector<4x32xf32>
    %270 = arith.subf %255, %269 : vector<4x32xf32>
    %cst_86 = arith.constant 9.99999974E-6 : f32
    %271 = vector.broadcast %cst_86 : f32 to vector<4x1xf32>
    %272 = arith.addf %268, %271 : vector<4x1xf32>
    %273 = math.rsqrt %272 : vector<4x1xf32>
    %274 = vector.broadcast %273 : vector<4x1xf32> to vector<4x32xf32>
    %275 = arith.mulf %270, %274 : vector<4x32xf32>
    %276 = vector.broadcast %256 : vector<1x32xf32> to vector<4x32xf32>
    %277 = arith.mulf %275, %276 : vector<4x32xf32>
    %278 = vector.broadcast %257 : vector<1x32xf32> to vector<4x32xf32>
    %279 = arith.addf %277, %278 : vector<4x32xf32>
    %cst_87 = arith.constant 0.000000e+00 : f32
    %280 = vector.broadcast %cst_87 : f32 to vector<4x32xf32>
    %281 = arith.maximumf %279, %280 : vector<4x32xf32>
    %c328 = arith.constant 328 : index
    %c0_88 = arith.constant 0 : index
    %282 = vector.load %arg5[%c328, %c0_88] : memref<408x128xf32, #tpu.memory_space<vmem>>, vector<32x32xf32>
    %cst_89 = arith.constant dense<0.000000e+00> : vector<4x32xf32>
    %283 = tpu.matmul %281, %282, %cst_89 {dimension_numbers = #tpu.dot_dimension_numbers<[1], [0], [0], [1], [0, 0, 1, 1], [], []>} : vector<4x32xf32>, vector<32x32xf32>, vector<4x32xf32> -> vector<4x32xf32>
    %c360 = arith.constant 360 : index
    %c0_90 = arith.constant 0 : index
    %284 = vector.load %arg5[%c360, %c0_90] : memref<408x128xf32, #tpu.memory_space<vmem>>, vector<1x32xf32>
    %285 = vector.broadcast %284 : vector<1x32xf32> to vector<4x32xf32>
    %286 = arith.addf %283, %285 : vector<4x32xf32>
    %cst_91 = arith.constant 0.000000e+00 : f32
    %287 = vector.broadcast %cst_91 : f32 to vector<4x32xf32>
    %288 = arith.maximumf %286, %287 : vector<4x32xf32>
    %c368 = arith.constant 368 : index
    %c0_92 = arith.constant 0 : index
    %289 = vector.load %arg5[%c368, %c0_92] : memref<408x128xf32, #tpu.memory_space<vmem>>, vector<32x1xf32>
    %cst_93 = arith.constant dense<0.000000e+00> : vector<4x1xf32>
    %290 = tpu.matmul %288, %289, %cst_93 {dimension_numbers = #tpu.dot_dimension_numbers<[1], [0], [0], [1], [0, 0, 1, 1], [], []>} : vector<4x32xf32>, vector<32x1xf32>, vector<4x1xf32> -> vector<4x1xf32>
    %c400 = arith.constant 400 : index
    %c0_94 = arith.constant 0 : index
    %291 = vector.load %arg5[%c400, %c0_94] : memref<408x128xf32, #tpu.memory_space<vmem>>, vector<1x1xf32>
    %292 = vector.broadcast %291 : vector<1x1xf32> to vector<4x1xf32>
    %293 = arith.addf %290, %292 : vector<4x1xf32>
    %294 = vector.shape_cast %293 : vector<4x1xf32> to vector<2x2xf32>
    %cst_95 = arith.constant dense<0.000000e+00> : vector<2xf32>
    %295 = vector.multi_reduction <add>, %294, %cst_95 [1] : vector<2x2xf32> to vector<2xf32>
    %cst_96 = arith.constant 2.000000e+00 : f32
    %296 = vector.broadcast %cst_96 : f32 to vector<2xf32>
    %297 = arith.divf %295, %296 : vector<2xf32>
    %cst_97 = arith.constant 0.000000e+00 : f32
    %298 = vector.broadcast %cst_97 : f32 to vector<2xf32>
    %299 = arith.subf %298, %297 : vector<2xf32>
    %300 = math.exp %299 : vector<2xf32>
    %cst_98 = arith.constant 1.000000e+00 : f32
    %301 = vector.broadcast %cst_98 : f32 to vector<2xf32>
    %302 = arith.addf %301, %300 : vector<2xf32>
    %cst_99 = arith.constant 1.000000e+00 : f32
    %303 = vector.broadcast %cst_99 : f32 to vector<2xf32>
    %304 = arith.divf %303, %302 : vector<2xf32>
    %c0_100 = arith.constant 0 : index
    %c0_101 = arith.constant 0 : index
    %c0_102 = arith.constant 0 : index
    %305 = vector.load %arg6[%c0_100, %c0_101, %c0_102] : memref<1x1x2xf32, #tpu.memory_space<vmem>>, vector<1x1x2xf32>
    %306 = vector.shape_cast %305 : vector<1x1x2xf32> to vector<2xf32>
    %307 = vector.shape_cast %304 : vector<2xf32> to vector<1x1x2xf32>
    tpu.vector_store %arg6[%c0_100, %c0_101, %c0_102], %307 {strides = array<i32>} : memref<1x1x2xf32, #tpu.memory_space<vmem>>, vector<1x1x2xf32>,
    return
  }
  func.func @transform_0(%arg0: i32) -> (i32, i32, i32) {
    %c0_i32 = arith.constant 0 : i32
    %c0_i32_0 = arith.constant 0 : i32
    %c0_i32_1 = arith.constant 0 : i32
    return %arg0, %c0_i32, %c0_i32_0 : i32, i32, i32
  }
  func.func @transform_1(%arg0: i32) -> (i32, i32, i32) {
    %c0_i32 = arith.constant 0 : i32
    %c0_i32_0 = arith.constant 0 : i32
    %c0_i32_1 = arith.constant 0 : i32
    return %arg0, %c0_i32, %c0_i32_0 : i32, i32, i32
  }
  func.func @transform_2(%arg0: i32) -> (i32, i32, i32) {
    %c0_i32 = arith.constant 0 : i32
    %c0_i32_0 = arith.constant 0 : i32
    %c0_i32_1 = arith.constant 0 : i32
    return %arg0, %c0_i32, %c0_i32_0 : i32, i32, i32
  }
  func.func @transform_3(%arg0: i32) -> (i32, i32, i32, i32) {
    %c0_i32 = arith.constant 0 : i32
    %c0_i32_0 = arith.constant 0 : i32
    %c0_i32_1 = arith.constant 0 : i32
    %c0_i32_2 = arith.constant 0 : i32
    return %arg0, %c0_i32, %c0_i32_0, %c0_i32_1 : i32, i32, i32, i32
  }
  func.func @transform_4(%arg0: i32) -> (i32, i32) {
    %c0_i32 = arith.constant 0 : i32
    %c0_i32_0 = arith.constant 0 : i32
    %c0_i32_1 = arith.constant 0 : i32
    return %c0_i32, %c0_i32_0 : i32, i32
  }
  func.func @transform_5(%arg0: i32) -> (i32, i32, i32) {
    %c0_i32 = arith.constant 0 : i32
    %c0_i32_0 = arith.constant 0 : i32
    %c0_i32_1 = arith.constant 0 : i32
    return %arg0, %c0_i32, %c0_i32_0 : i32, i32, i32
  }
}

</mosaic_0001>

<bundles_post_ra>
// kernel: model_pool_ln_forward.1
= control target key start
LH: loop header
LB: loop body
LE: loop exit
PB: predicated region body
PF: predicated region fallthrough
CT: control target
= control target key end

     0   :  { %10 = vsyncpa [#allocation3], 0  ;;  %s2219_s18 = smov 0   ;;  %s2463_s0 = inlined_call_operand.vmem [shape: f32[4,8,4], index: 0, kind: input, shape index: {}]   ;;  %s2464_s1 = inlined_call_operand.vmem [shape: f32[4,8,8], index: 1, kind: input, shape index: {}]   ;;  %s2465_s2 = inlined_call_operand.vmem [shape: f32[4,8,8], index: 2, kind: input, shape index: {}]   ;;  %s2466_s3 = inlined_call_operand.vmem [shape: f32[4,5,8,8], index: 3, kind: input, shape index: {}]   ;;  %s2467_s4 = inlined_call_operand.hbm [shape: f32[408,128], index: 4, kind: input, shape index: {}]   ;;  %s2468_s5 = inlined_call_operand.vmem [shape: f32[2,1,2], index: 5, kind: output, shape index: {}]  }
   0x1 LB: > { %s183_s21 = sshll.u32 %s2467_s4, 4  ;;  %s2228_s22 = sadd.s32 4294967295, %s2174_s18   ;;  %s2174_s18 = sphi %s2219_s18, %s16_s18   ;;  %s184_s21 = int_to_ptr.hbm [resolvable:$true] %s183_s21 }
   0x2   : > { %p1954_p0 = scmp.ge.s32.totalorder %s2174_s18, 1  ;;  %p172_p1 = scmp.lt.s32.totalorder %s2174_s18, 3 }
   0x3   : > { %p2025_p2 = scmp.eq.s32.totalorder %s2228_s22, 0  ;;  %s2176_s23 = smov [#allocation2]  }
   0x4   : > { %p173_p3 = pnand %p1954_p0, %p172_p1  ;;  %s185_s24 = sshll.u32 %s2176_s23, 4  ;;  %s186_s24 = int_to_ptr.vmem [resolvable:$true] %s185_s24 }
   0x5   : > { %s2177_s25 = smov 128   ;;  %s2178_s26 = smov 8  }
   0x6   : > { %p2021_p4 = pneg %p173_p3  ;;  %238 = sbr.rel (%p173_p3) target bundleno = 5106 (0x13f2), region = 40 }
   0x8   : > { %p2022_p5 = pnand %p2025_p2, %p2021_p4 }
   0xa   : > { %2024 = dma.hbm_to_vmem [thread:$0]  (!%p2022_p5), %s184_s21, 6528, %s186_s24, [#allocation3], %s2177_s25, %s2177_s25, %s2178_s26  }
   0xb   : > { %2169 = dma.done.wait (%p2025_p2), [#allocation3], 6528  }
   0xc   : > { %2171 = vsyncadd (%p2025_p2), [#allocation3], 4294960768  ;;  %s1959_s27 = sshll.u32 %s2228_s22, 1  ;;  %vm335_vm0 = vcmask 1043456   ;;  %vm328_vm1 = vcmask 31744   ;;  %v365_v2 = vld [vmem:[#allocation2 + $0x30] sm:$0xff] }
   0xd   : > { %p282_p6 = scmp.lt.s32.totalorder %s1959_s27, 3  ;;  %v325_v0 = vld [vmem:[#allocation2] sm:$0xf]  ;;  %v364_v3 = vld [vmem:[#allocation2 + $0x28] sm:$0xff]  ;;  %385 = vmatpush.msra.mxu1 %v365_v2  ;;  %v362_v6 = vld [vmem:[#allocation2 + $0x18] sm:$0xff]  ;;  %vm366_vm2 = vcmask 261120  }
   0xe   : > { %1967 = vmatpush.msk.msra.mxu0 %vm335_vm0, %v325_v0  ;;  %v363_v5 = vld [vmem:[#allocation2 + $0x20] sm:$0xff]  ;;  %v2065_v7 = vld [vmem:[#allocation2 + $0x8] ss:$0 sm:$0xff]  ;;  %s2179_s7 = smov 96   ;;  %v2180_v12 = vmov 4   ;;  %v2181_v13 = vmov 2  }
   0xf   : > { %s2470_s27 = smov (!%p282_p6, %s1959_s27), 3  ;;  %386 = vmatpush.msra.mxu1 %v364_v3  ;;  %2053 = vset.pattern.permute.xlu0 %v2180_v12  ;;  %v2182_v14 = vmov 0   ;;  %v2183_v19 = vmov 3   ;;  %v2184_v20 = vmov 1   ;;  %vm510_vm4 = vcmask 64512   ;;  %s2185_s15 = smov 64  }
  0x10   : > { %s2237_s28 = sshll.u32 %s2470_s27, 3  ;;  %2051 = vset.pattern.permute.xlu2 %v2181_v13  ;;  %2049 = vset.pattern.permute.xlu1 %v2182_v14  ;;  %s2016_s8 = smul.u32 40, %s2470_s27  ;;  %vm650_vm8 = vcmask 1044480   ;;  %vm631_vm9 = vcmask 7168   ;;  %vm634_vm10 = vcmask 15360   ;;  %vm637_vm11 = vcmask 23552  }
  0x11   : > { %s285_s6 = scalar_lea.vmem %s2463_s0, %s2237_s28  ;;  %387 = vmatpush.msra.mxu1 %v363_v5  ;;  %s2292_s14 = scalar_lea.vmem %s2465_s2, %s2237_s28  ;;  %vm643_vm12 = vcmask 39936  }
  0x12   : > { %v309_v1 = vld [vmem:[%s285_s6] sm:$0xff]  ;;  %v310_v4 = vld [vmem:[%s285_s6 + $0x8] sm:$0xff]  ;;  %s2268_s11 = scalar_lea.vmem %s2466_s3, %s2016_s8  ;;  %s2186_s16 = smov 32  }
  0x13   : > { %1968 = vmatmul.msk.f32.vlgmr.msra.gmra.mxu0 %vm328_vm1, %v309_v1  ;;  %388 = vmatpush.msra.mxu1 %v362_v6  ;;  %v2271_v23 = vld [vmem:[%s2268_s11] sm:$0xff]  ;;  %v2274_v24 = vld [vmem:[%s2268_s11 + $0x8] sm:$0xff]  ;;  %v2277_v25 = vld [vmem:[%s2268_s11 + $0x10] sm:$0xff]  ;;  %s291_s20 = scalar_lea.vmem %s2464_s1, %s2237_s28  ;;  %p306_p7 = scmp.lt.s32.totalorder %s2228_s22, 1 }
  0x14   : > { %v2282_v30 = vld [vmem:[%s2268_s11 + $0x18] sm:$0xff]  ;;  %v2286_v33 = vld [vmem:[%s2268_s11 + $0x20] sm:$0xff]  ;;  %v2298_v45 = vld [vmem:[%s2268_s11 + $0x28] sm:$0xff] }
  0x15   : > { %v313_v39 = vld [vmem:[%s2292_s14] sm:$0xff]  ;;  %v2302_v47 = vld [vmem:[%s2268_s11 + $0x30] sm:$0xff]  ;;  %v2307_v50 = vld [vmem:[%s2268_s11 + $0x38] sm:$0xff]  ;;  %s2472_s22 = smov (!%p306_p7, %s2228_s22), 1 }
  0x16   : > { %vm506_vm3 = vcmp.gt.f32.partialorder %v313_v39, 0.0  ;;  %v2311_v52 = vld [vmem:[%s2268_s11 + $0x40] sm:$0xff]  ;;  %v2315_v57 = vld [vmem:[%s2268_s11 + $0x48] sm:$0xff]  ;;  %s308_s24 = scalar_lea.vmem %s2468_s5, %s2472_s22 }
  0x17   : > { %v314_v63 = vld [vmem:[%s2292_s14 + $0x8] sm:$0xff] }
  0x18   : > { %vm507_vm5 = vcmp.gt.f32.partialorder %v314_v63, 0.0 }
  0x1b   : > { %1969 = vmatmul.msk.f32.gmra.mxu0 %vm328_vm1, %v310_v4 }
  0x90   : > { %v356_v8 = vpop.f32.mrf.mxu0 }
  0x91   : > { %v2246_v9 = vadd.f32 %v2065_v7, %v356_v8 }
  0x93   : > { %458 = vrot.lane.b32.xlu0 %v2246_v9, %s2179_s7  ;;  %1970 = vmatmul.msk.f32.vlgmr.msra.gmra.mxu1 %vm366_vm2, %v2246_v9 }
  0x98   : > { %v359_v10 = vpop.f32.mrf.mxu0 }
  0x99   : > { %v2251_v11 = vadd.f32 %v2065_v7, %v359_v10 }
  0x9b   : > { %482 = vrot.lane.b32.xlu0 %v2251_v11, %s2179_s7  ;;  %1971 = vmatmul.msk.f32.gmra.mxu1 %vm366_vm2, %v2251_v11  ;;  %v2058_v5 = vpack.i.bf16 %v2251_v11, %v2246_v9 }
 0x105   : > { %v459_v15 = vpop.permute.xlu0 %458 }
 0x106   : > { %1972 = vmatpush.xpose.msk.msra.mxu2 %vm366_vm2, %v459_v15 }
 0x109   : > { %1973 = vmatmul.msk.f32.vlgmr.msra.gmra.mxu2 %vm366_vm2, %v2246_v9 }
 0x10d   : > { %v483_v16 = vpop.permute.xlu0 %482 }
 0x10e   : > { %1974 = vmatpush.xpose.msk.msra.mxu3 %vm366_vm2, %v483_v16 }
 0x110   : > { %v390_v17 = vpop.f32.mrf.mxu1 }
 0x111   : > { %1975 = vmatmul.msk.f32.vlgmr.msra.gmra.mxu3 %vm366_vm2, %v2251_v11  ;;  %447 = vperm.xlu0 %2053, %v390_v17  }
 0x112   : > { %423 = vperm.xlu2 %2051, %v390_v17   ;;  %398 = vperm.xlu1 %2049, %v390_v17  }
 0x118   : > { %v393_v18 = vpop.f32.mrf.mxu1 }
 0x119   : > { %451 = vperm.xlu0 %2053, %v393_v18  }
 0x11a   : > { %2052 = vset.pattern.permute.xlu2 %v2183_v19  ;;  %2050 = vset.pattern.permute.xlu1 %v2184_v20 }
 0x11b   : > { %435 = vperm.xlu2 %2052, %v390_v17   ;;  %411 = vperm.xlu1 %2050, %v390_v17  }
 0x123   : > { %2055 = vset.pattern.permute.xlu2 %v2184_v20  ;;  %2054 = vset.pattern.permute.xlu1 %v2182_v14 }
 0x124   : > { %415 = vperm.xlu2 %2055, %v393_v18   ;;  %403 = vperm.xlu1 %2054, %v393_v18  }
 0x12c   : > { %2057 = vset.pattern.permute.xlu2 %v2183_v19  ;;  %2056 = vset.pattern.permute.xlu1 %v2181_v13 }
 0x12d   : > { %439 = vperm.xlu2 %2057, %v393_v18   ;;  %427 = vperm.xlu1 %2056, %v393_v18  }
 0x16c   : > { %v424_v21 = vpop.permute.xlu2 %423 }
 0x16d   : > { %v430_v31 = vmul.f32 %v424_v21, %v2277_v25 }
 0x175   : > { %v436_v26 = vpop.permute.xlu2 %435 }
 0x176   : > { %v442_v35 = vmul.f32 %v436_v26, %v2282_v30 }
 0x17e   : > { %v416_v40 = vpop.permute.xlu2 %415 }
 0x17f   : > { %v419_v51 = vmul.f32 %v416_v40, %v2302_v47 }
 0x183   : > { %v448_v34 = vpop.permute.xlu0 %447 }
 0x184   : > { %v399_v22 = vpop.permute.xlu1 %398  ;;  %v454_v37 = vmul.f32 %v448_v34, %v2286_v33 }
 0x185   : > { %v406_v28 = vmul.f32 %v399_v22, %v2271_v23 }
 0x187   : > { %v440_v53 = vpop.permute.xlu2 %439 }
 0x188   : > { %v443_v59 = vmul.f32 %v440_v53, %v2311_v52 }
 0x18b   : > { %v452_v58 = vpop.permute.xlu0 %451 }
 0x18c   : > { %v479_v43 = vpop.f32.mrf.mxu2  ;;  %v455_v61 = vmul.f32 %v452_v58, %v2315_v57 }
 0x18d   : > { %v412_v27 = vpop.permute.xlu1 %411 }
 0x18e   : > { %v418_v29 = vmul.f32 %v412_v27, %v2274_v24 }
 0x190   : > { %v420_v32 = vadd.f32 %v418_v29, %v406_v28 }
 0x192   : > { %v432_v36 = vadd.f32 %v430_v31, %v420_v32 }
 0x194   : > { %v444_v38 = vadd.f32 %v442_v35, %v432_v36  ;;  %v503_v1 = vpop.f32.mrf.mxu3 }
 0x196   : > { %v404_v41 = vpop.permute.xlu1 %403  ;;  %v456_v42 = vadd.f32 %v454_v37, %v444_v38 }
 0x197   : > { %v407_v49 = vmul.f32 %v404_v41, %v2298_v45 }
 0x198   : > { %v480_v44 = vadd.f32 %v479_v43, %v456_v42 }
 0x199   : > { %v421_v55 = vadd.f32 %v419_v51, %v407_v49 }
 0x19a   : > { %v508_v46 = vsel %vm506_vm3, %v480_v44, -1e+30 }
 0x19b   : > { %v511_v48 = vsel %vm510_vm4, %v508_v46, -inf }
 0x19c   : > { %512 = vmax.xlane.f32.xlu1 %v511_v48 }
 0x19f   : > { %v428_v54 = vpop.permute.xlu1 %427 }
 0x1a0   : > { %v431_v56 = vmul.f32 %v428_v54, %v2307_v50 }
 0x1a2   : > { %v433_v60 = vadd.f32 %v431_v56, %v421_v55 }
 0x1a4   : > { %v445_v62 = vadd.f32 %v443_v59, %v433_v60 }
 0x1a6   : > { %v457_v0 = vadd.f32 %v455_v61, %v445_v62 }
 0x1a8   : > { %v504_v2 = vadd.f32 %v503_v1, %v457_v0 }
 0x1aa   : > { %v509_v3 = vsel %vm507_vm5, %v504_v2, -1e+30 }
 0x1ab   : > { %v514_v4 = vsel %vm510_vm4, %v509_v3, -inf }
 0x1ac   : > { %515 = vmax.xlane.f32.xlu2 %v514_v4 }
 0x1b5   : > { %2059 = vrot.lane.b32.xlu1 %v2058_v5, %s2185_s15 }
 0x20f   : > { %v513_v6 = vpop.xlane.xlu1 %512 }
 0x210   : > { %v517_v7 = vsub.f32 %v508_v46, %v513_v6 }
 0x212   : > { %v519_v8 = vmul.f32 1.442695, %v517_v7 }
 0x214   : > { %2078 = vpow2.f32 %v519_v8 }
 0x21a   : > { %v2079_v10 = vpop.eup %2078 }
 0x21b   : > { %v523_v12 = vsel %vm506_vm3, %v2079_v10, 0.0 }
 0x21c   : > { %v525_v13 = vsel %vm510_vm4, %v523_v12, 0.0 }
 0x21d   : > { %526 = vadd.xlane.f32.xlu0 %v525_v13 }
 0x21f   : > { %v516_v15 = vpop.xlane.xlu2 %515 }
 0x220   : > { %v518_v16 = vsub.f32 %v509_v3, %v516_v15 }
 0x222   : > { %v521_v17 = vmul.f32 1.442695, %v518_v16 }
 0x224   : > { %2080 = vpow2.f32 %v521_v17 }
 0x227   : > { %v2060_v18 = vpop.permute.xlu1 %2059 }
 0x228   : > { %v2061_v19 = vunpack.i.l.bf16 %v2060_v18  ;;  %v2062_v20 = vunpack.i.h.bf16 %v2060_v18 }
 0x22a   : > { %v2081_v21 = vpop.eup %2080  ;;  %560 = vmatpush.msrb.mxu2 %v2061_v19  ;;  %586 = vmatpush.msrb.mxu3 %v2062_v20  ;;  %v2187_v20 = vmov 32.0  }
 0x22b   : > { %v524_v22 = vsel %vm507_vm5, %v2081_v21, 0.0 }
 0x22c   : > { %v528_v26 = vsel %vm510_vm4, %v524_v22, 0.0 }
 0x22d   : > { %529 = vadd.xlane.f32.xlu2 %v528_v26 }
 0x290   : > { %v527_v27 = vpop.xlane.xlu0 %526 }
 0x291   : > { %vm531_vm6 = vcmp.eq.f32.partialorder %v527_v27, 0.0 }
 0x292   : > { %v533_v28 = vsel %vm531_vm6, 1.0, %v527_v27 }
 0x293   : > { %2082 = vrcp.f32 %v533_v28 }
 0x299   : > { %v2083_v29 = vpop.eup %2082 }
 0x29a   : > { %v537_v31 = vmul.f32 %v2083_v29, %v523_v12 }
 0x29c   : > { %1976 = vmatmul.msk.f32.vlgmr.msrb.gmra.mxu2 %vm510_vm4, %v537_v31  ;;  %v599_v32 = vmul.f32 %v537_v31, %v2274_v24  ;;  %v591_v34 = vmul.f32 %v537_v31, %v2271_v23  ;;  %v615_v39 = vmul.f32 %v537_v31, %v2282_v30  ;;  %v607_v40 = vmul.f32 %v537_v31, %v2277_v25 }
 0x29d   : > { %v623_v43 = vmul.f32 %v537_v31, %v2286_v33 }
 0x29e   : > { %v601_v35 = vsel %vm510_vm4, %v599_v32, 0.0  ;;  %v593_v36 = vsel %vm510_vm4, %v591_v34, 0.0  ;;  %v617_v41 = vsel %vm510_vm4, %v615_v39, 0.0  ;;  %v609_v24 = vsel %vm510_vm4, %v607_v40, 0.0 }
 0x29f   : > { %602 = vadd.xlane.f32.xlu0 %v601_v35  ;;  %594 = vadd.xlane.f32.xlu2 %v593_v36  ;;  %v625_v48 = vsel %vm510_vm4, %v623_v43, 0.0  ;;  %v748_v43 = vld [vmem:[#allocation2 + $0x48] sm:$0xff] }
 0x2a0   : > { %v530_v37 = vpop.xlane.xlu2 %529 }
 0x2a1   : > { %vm532_vm7 = vcmp.eq.f32.partialorder %v530_v37, 0.0 }
 0x2a2   : > { %v534_v38 = vsel %vm532_vm7, 1.0, %v530_v37 }
 0x2a3   : > { %2084 = vrcp.f32 %v534_v38 }
 0x2a4   : > { %2086 = vrcp.f32 %v2187_v20 }
 0x2a7   : > { %618 = vadd.xlane.f32.xlu0 %v617_v41  ;;  %610 = vadd.xlane.f32.xlu2 %v609_v24  ;;  %v751_v24 = vld [vmem:[#allocation2 + $0x60] sm:$0xff] }
 0x2a8   : > { %772 = vmatpush.msra.mxu2 %v751_v24 }
 0x2a9   : > { %v2085_v23 = vpop.eup %2084 }
 0x2aa   : > { %v538_v42 = vmul.f32 %v2085_v23, %v524_v22  ;;  %v2087_v21 = vpop.eup %2086  ;;  %v750_v23 = vld [vmem:[#allocation2 + $0x58] sm:$0xff] }
 0x2ab   : > { %v696_v22 = vmul.f32 32.0, %v2087_v21  ;;  %vm700_vm13 = vweird.f32 %v2087_v21  ;;  %773 = vmatpush.msra.mxu2 %v750_v23 }
 0x2ac   : > { %1977 = vmatmul.msk.f32.vlgmr.msrb.gmra.mxu3 %vm510_vm4, %v538_v42  ;;  %v600_v44 = vmul.f32 %v538_v42, %v2302_v47  ;;  %v592_v46 = vmul.f32 %v538_v42, %v2298_v45  ;;  %v616_v49 = vmul.f32 %v538_v42, %v2311_v52  ;;  %v608_v51 = vmul.f32 %v538_v42, %v2307_v50  ;;  %v642_v52 = vld [vmem:[#allocation2 + $0x10] sm:$0x1f] }
 0x2ad   : > { %v624_v45 = vmul.f32 %v538_v42, %v2315_v57  ;;  %1978 = vmatpush.msk.msrb.mxu0 %vm650_vm8, %v642_v52  ;;  %v697_v26 = vsub.f32 1.0, %v696_v22  ;;  %v749_v42 = vld [vmem:[#allocation2 + $0x50] sm:$0xff] }
 0x2ae   : > { %v604_v30 = vsel %vm510_vm4, %v600_v44, 0.0  ;;  %v596_v25 = vsel %vm510_vm4, %v592_v46, 0.0  ;;  %v620_v33 = vsel %vm510_vm4, %v616_v49, 0.0  ;;  %v612_v47 = vsel %vm510_vm4, %v608_v51, 0.0  ;;  %774 = vmatpush.msra.mxu2 %v749_v42 }
 0x2af   : > { %605 = vadd.xlane.f32.xlu1 %v604_v30  ;;  %597 = vadd.xlane.f32.xlu0 %v596_v25  ;;  %v628_v53 = vsel %vm510_vm4, %v624_v45, 0.0  ;;  %v698_v27 = vmul.f32 %v2087_v21, %v697_v26 }
 0x2b0   : > { %626 = vadd.xlane.f32.xlu2 %v625_v48  ;;  %775 = vmatpush.msra.mxu2 %v748_v43  ;;  %v1001_v43 = vlaneseq }
 0x2b1   : > { %v699_v28 = vadd.f32 %v2087_v21, %v698_v27 }
 0x2b3   : > { %v2360_v29 = vsel %vm700_vm13, %v2087_v21, %v699_v28 }
 0x2b7   : > { %621 = vadd.xlane.f32.xlu0 %v620_v33 }
 0x2b8   : > { %613 = vadd.xlane.f32.xlu2 %v612_v47 }
 0x2c0   : > { %629 = vadd.xlane.f32.xlu2 %v628_v53 }
 0x2cb   : > { %679 = vrot.lane.b32.xlu0 %v2246_v9, %s2186_s16 }
 0x2d8   : > { %681 = vrot.lane.b32.xlu2 %v2251_v11, %s2186_s16 }
 0x312   : > { %v603_v50 = vpop.xlane.xlu0 %602  ;;  %v595_v54 = vpop.xlane.xlu2 %594 }
 0x313   : > { %v632_v57 = vsel %vm631_vm9, %v595_v54, %v603_v50  ;;  %v2066_v50 = vld [vmem:[#allocation2 + $0x38] ss:$0 sm:$0xff] }
 0x31a   : > { %v611_v55 = vpop.xlane.xlu2 %610  ;;  %v619_v56 = vpop.xlane.xlu0 %618 }
 0x31b   : > { %v635_v58 = vsel %vm634_vm10, %v632_v57, %v611_v55 }
 0x31c   : > { %v638_v59 = vsel %vm637_vm11, %v635_v58, %v619_v56  ;;  %v2067_v56 = vld [vmem:[#allocation2 + $0x40] ss:$0 sm:$0xff] }
 0x31f   : > { %v562_v5 = vpop.f32.mrf.mxu2 }
 0x322   : > { %v598_v11 = vpop.xlane.xlu0 %597  ;;  %v606_v62 = vpop.xlane.xlu1 %605 }
 0x323   : > { %v627_v60 = vpop.xlane.xlu2 %626  ;;  %v633_v63 = vsel %vm631_vm9, %v598_v11, %v606_v62  ;;  %vm1010_vm9 = vcmask 27648  }
 0x324   : > { %v640_v9 = vsel %vm328_vm1, %v638_v59, %v627_v60 }
 0x325   : > { %1979 = vmatmul.msk.f32.vlgmr.msrb.gmra.mxu0 %vm643_vm12, %v640_v9 }
 0x32a   : > { %v622_v0 = vpop.xlane.xlu0 %621 }
 0x32b   : > { %v614_v61 = vpop.xlane.xlu2 %613 }
 0x32c   : > { %v636_v1 = vsel %vm634_vm10, %v633_v63, %v614_v61 }
 0x32d   : > { %v639_v3 = vsel %vm637_vm11, %v636_v1, %v622_v0 }
 0x32f   : > { %v588_v13 = vpop.f32.mrf.mxu3 }
 0x333   : > { %v630_v2 = vpop.xlane.xlu2 %629 }
 0x334   : > { %v641_v4 = vsel %vm328_vm1, %v639_v3, %v630_v2 }
 0x335   : > { %1980 = vmatmul.msk.f32.gmra.mxu0 %vm643_vm12, %v641_v4 }
 0x33b   : > { %v682_v17 = vpop.permute.xlu2 %681 }
 0x33d   : > { %v680_v8 = vpop.permute.xlu0 %679 }
 0x3a2   : > { %v671_v6 = vpop.f32.mrf.mxu0 }
 0x3a3   : > { %v677_v7 = vadd.f32 %v671_v6, %v562_v5  ;;  %v2068_v5 = vld [vmem:[#allocation2 + $0x68] ss:$0 sm:$0xff] }
 0x3a5   : > { %v685_v10 = vadd.f32 %v680_v8, %v677_v7 }
 0x3a7   : > { %v689_v12 = vsel %vm366_vm2, %v685_v10, 0.0 }
 0x3a8   : > { %690 = vadd.xlane.f32.xlu0 %v689_v12 }
 0x3b2   : > { %v674_v15 = vpop.f32.mrf.mxu0 }
 0x3b3   : > { %v678_v16 = vadd.f32 %v674_v15, %v588_v13 }
 0x3b5   : > { %v686_v18 = vadd.f32 %v682_v17, %v678_v16 }
 0x3b7   : > { %v692_v19 = vsel %vm366_vm2, %v686_v18, 0.0 }
 0x3b8   : > { %693 = vadd.xlane.f32.xlu1 %v692_v19 }
 0x41b   : > { %v691_v31 = vpop.xlane.xlu0 %690 }
 0x41c   : > { %v702_v32 = vmul.f32 %v2360_v29, %v691_v31 }
 0x41e   : > { %v704_v34 = vsub.f32 %v685_v10, %v702_v32 }
 0x420   : > { %v706_v35 = vmul.f32 %v704_v34, %v704_v34 }
 0x422   : > { %v708_v36 = vsel %vm366_vm2, %v706_v35, 0.0 }
 0x423   : > { %709 = vadd.xlane.f32.xlu2 %v708_v36 }
 0x42b   : > { %v694_v37 = vpop.xlane.xlu1 %693 }
 0x42c   : > { %v703_v38 = vmul.f32 %v2360_v29, %v694_v37  ;;  %v312_v37 = vld [vmem:[%s291_s20 + $0x8] sm:$0xff] }
 0x42d   : > { %950 = vmatpush.msrb.mxu1 %v312_v37  ;;  %v1115_v37 = vld [vmem:[#allocation2 + $0x70] sm:$0xff] }
 0x42e   : > { %v705_v39 = vsub.f32 %v686_v18, %v703_v38  ;;  %v311_v38 = vld [vmem:[%s291_s20] sm:$0xff] }
 0x430   : > { %v707_v40 = vmul.f32 %v705_v39, %v705_v39 }
 0x432   : > { %v711_v41 = vsel %vm366_vm2, %v707_v40, 0.0 }
 0x433   : > { %712 = vadd.xlane.f32.xlu1 %v711_v41 }
 0x496   : > { %v710_v44 = vpop.xlane.xlu2 %709 }
 0x497   : > { %v714_v46 = vmul.f32 %v710_v44, %v2360_v29  ;;  %v2387_v44 = vshrl.u32 %v1001_v43, 7 }
 0x499   : > { %v716_v30 = vadd.f32 1e-05, %v714_v46  ;;  %v2389_v46 = vand.u32 127, %v1001_v43  ;;  %v2069_v43 = vld [vmem:[#allocation2 + $0xb0] ss:$0 sm:$0xff] }
 0x49b   : > { %2088 = vrsqrt.f32 %v716_v30  ;;  %vm724_vm15 = vweird.f32 %v716_v30  ;;  %vm1005_vm8 = vcmp.eq.s32.totalorder %v2387_v44, %v2389_v46 }
 0x4a1   : > { %v2089_v25 = vpop.eup %2088 }
 0x4a2   : > { %v719_v48 = vmul.f32 %v2089_v25, %v716_v30  ;;  %vm725_vm14 = vweird.f32 %v2089_v25 }
 0x4a3   : > { %vm726_vm3 = vmor %vm724_vm15, %vm725_vm14  ;;  %vm1191_vm14 = vcmask 523264  }
 0x4a4   : > { %v720_v49 = vmul.f32 %v2089_v25, %v719_v48 }
 0x4a6   : > { %v721_v51 = vmul.f32 0.5, %v720_v49  ;;  %v713_v33 = vpop.xlane.xlu1 %712 }
 0x4a7   : > { %v715_v47 = vmul.f32 %v713_v33, %v2360_v29 }
 0x4a8   : > { %v722_v45 = vsub.f32 1.5, %v721_v51 }
 0x4a9   : > { %v717_v53 = vadd.f32 1e-05, %v715_v47 }
 0x4aa   : > { %v723_v52 = vmul.f32 %v2089_v25, %v722_v45 }
 0x4ab   : > { %2090 = vrsqrt.f32 %v717_v53  ;;  %vm734_vm6 = vweird.f32 %v717_v53 }
 0x4ac   : > { %v727_v54 = vsel %vm726_vm3, %v2089_v25, %v723_v52 }
 0x4ad   : > { %v738_v55 = vmul.f32 %v727_v54, %v704_v34 }
 0x4af   : > { %v741_v57 = vmul.f32 %v2066_v50, %v738_v55 }
 0x4b1   : > { %v2091_v58 = vpop.eup %2090  ;;  %v744_v59 = vadd.f32 %v2067_v56, %v741_v57 }
 0x4b2   : > { %v729_v60 = vmul.f32 %v2091_v58, %v717_v53  ;;  %vm735_vm5 = vweird.f32 %v2091_v58 }
 0x4b3   : > { %v746_v9 = vmax.f32 %v744_v59, 0.0  ;;  %vm736_vm7 = vmor %vm734_vm6, %vm735_vm5  ;;  %vm1276_vm6 = vcmask 11264  }
 0x4b4   : > { %v730_v11 = vmul.f32 %v2091_v58, %v729_v60 }
 0x4b5   : > { %1981 = vmatmul.msk.f32.vlgmr.msra.gmra.mxu2 %vm366_vm2, %v746_v9  ;;  %855 = vmatpush.msra.mxu3 %v746_v9 }
 0x4b6   : > { %v731_v61 = vmul.f32 0.5, %v730_v11 }
 0x4b8   : > { %v732_v62 = vsub.f32 1.5, %v731_v61 }
 0x4ba   : > { %v733_v63 = vmul.f32 %v2091_v58, %v732_v62 }
 0x4bc   : > { %v737_v0 = vsel %vm736_vm7, %v2091_v58, %v733_v63  ;;  %vm1628_vm7 = vcmask 1041408  }
 0x4bd   : > { %v739_v1 = vmul.f32 %v737_v0, %v705_v39 }
 0x4bf   : > { %v742_v2 = vmul.f32 %v2066_v50, %v739_v1 }
 0x4c1   : > { %v745_v3 = vadd.f32 %v2067_v56, %v742_v2 }
 0x4c3   : > { %v747_v4 = vmax.f32 %v745_v3, 0.0 }
 0x4c5   : > { %1982 = vmatmul.msk.f32.gmra.mxu2 %vm366_vm2, %v747_v4  ;;  %910 = vmatpush.msrb.mxu3 %v747_v4 }
 0x538   : > { %v777_v6 = vpop.f32.mrf.mxu2 }
 0x539   : > { %v778_v7 = vadd.f32 %v2068_v5, %v777_v6 }
 0x53b   : > { %v783_v8 = vsel %vm328_vm1, %v778_v7, -inf }
 0x53c   : > { %784 = vmax.xlane.f32.xlu1 %v783_v8 }
 0x548   : > { %v780_v10 = vpop.f32.mrf.mxu2 }
 0x549   : > { %v781_v12 = vadd.f32 %v2068_v5, %v780_v10  ;;  %v1246_v10 = vld [vmem:[#allocation2 + $0xe0] sm:$0xff] }
 0x54b   : > { %v786_v13 = vsel %vm328_vm1, %v781_v12, -inf }
 0x54c   : > { %787 = vmax.xlane.f32.xlu1 %v786_v13  ;;  %v1244_v13 = vld [vmem:[#allocation2 + $0xd0] sm:$0xff] }
 0x5af   : > { %v785_v15 = vpop.xlane.xlu1 %784 }
 0x5b0   : > { %v789_v16 = vsub.f32 %v778_v7, %v785_v15  ;;  %v1243_v15 = vld [vmem:[#allocation2 + $0xc8] sm:$0xff] }
 0x5b2   : > { %v791_v17 = vmul.f32 1.442695, %v789_v16 }
 0x5b4   : > { %2092 = vpow2.f32 %v791_v17 }
 0x5ba   : > { %v2093_v18 = vpop.eup %2092 }
 0x5bb   : > { %v795_v19 = vsel %vm328_vm1, %v2093_v18, 0.0 }
 0x5bc   : > { %796 = vadd.xlane.f32.xlu1 %v795_v19 }
 0x5bf   : > { %v788_v20 = vpop.xlane.xlu1 %787 }
 0x5c0   : > { %v790_v21 = vsub.f32 %v781_v12, %v788_v20  ;;  %v1245_v12 = vld [vmem:[#allocation2 + $0xd8] sm:$0xff] }
 0x5c2   : > { %v793_v22 = vmul.f32 1.442695, %v790_v21 }
 0x5c4   : > { %2094 = vpow2.f32 %v793_v22 }
 0x5ca   : > { %v2095_v26 = vpop.eup %2094 }
 0x5cb   : > { %v798_v27 = vsel %vm328_vm1, %v2095_v26, 0.0 }
 0x5cc   : > { %799 = vadd.xlane.f32.xlu0 %v798_v27  ;;  %v1122_v27 = vld [vmem:[#allocation2 + $0xa8] sm:$0xff] }
 0x62f   : > { %v797_v28 = vpop.xlane.xlu1 %796 }
 0x630   : > { %2096 = vrcp.f32 %v797_v28  ;;  %v1121_v28 = vld [vmem:[#allocation2 + $0xa0] sm:$0xff] }
 0x636   : > { %v2097_v31 = vpop.eup %2096 }
 0x637   : > { %v803_v32 = vmul.f32 %v2097_v31, %v2093_v18  ;;  %v1120_v31 = vld [vmem:[#allocation2 + $0x98] sm:$0xff] }
 0x639   : > { %805 = vxpose.xlu1.b32.start.end [1/1] (short) (narrow) %v803_v32, 8  ;;  %973 = vmatpush.msra.mxu0 %v803_v32  ;;  %v1119_v32 = vld [vmem:[#allocation2 + $0x90] sm:$0xff] }
 0x63b   : > { %1202 = vmatpush.msrb.mxu0 %v1122_v27 }
 0x63d   : > { %1203 = vmatpush.msrb.mxu0 %v1121_v28 }
 0x63f   : > { %v800_v34 = vpop.xlane.xlu0 %799  ;;  %1204 = vmatpush.msrb.mxu0 %v1120_v31 }
 0x640   : > { %2098 = vrcp.f32 %v800_v34  ;;  %v1118_v34 = vld [vmem:[#allocation2 + $0x88] sm:$0xff] }
 0x641   : > { %1205 = vmatpush.msrb.mxu0 %v1119_v32 }
 0x643   : > { %1206 = vmatpush.msrb.mxu0 %v1118_v34 }
 0x646   : > { %v2099_v35 = vpop.eup %2098 }
 0x647   : > { %v804_v36 = vmul.f32 %v2099_v35, %v2095_v26  ;;  %v1117_v35 = vld [vmem:[#allocation2 + $0x80] sm:$0xff] }
 0x648   : > { %1207 = vmatpush.msrb.mxu0 %v1117_v35 }
 0x649   : > { %860 = vxpose.xlu0.b32.start.end [1/1] (short) (narrow) %v804_v36, 8  ;;  %996 = vmatpush.msrb.mxu2 %v804_v36  ;;  %v1116_v36 = vld [vmem:[#allocation2 + $0x78] sm:$0xff] }
 0x64a   : > { %1208 = vmatpush.msrb.mxu0 %v1116_v36 }
 0x64b   : > { %1264 = vmatpush.msra.mxu2 %v1246_v10 }
 0x64c   : > { %1209 = vmatpush.msrb.mxu0 %v1115_v37 }
 0x64d   : > { %1265 = vmatpush.msra.mxu2 %v1245_v12 }
 0x64f   : > { %1266 = vmatpush.msra.mxu2 %v1244_v13 }
 0x651   : > { %1267 = vmatpush.msra.mxu2 %v1243_v15 }
 0x6dd   : > { %v821_v39 = vpop.trf.xlu1 }
 0x6de   : > { %1983 = vmatmul.msk.f32.vlgmr.msra.gmra.mxu3 %vm510_vm4, %v821_v39 }
 0x6df   : > { %930 = vmatpush.msra.mxu3 %v311_v38 }
 0x6ed   : > { %v876_v40 = vpop.trf.xlu0 }
 0x6ee   : > { %1984 = vmatmul.msk.f32.vlgmr.msrb.gmra.mxu3 %vm510_vm4, %v876_v40  ;;  %1986 = vmatmul.msk.f32.vlgmr.msrb.gmra.mxu1 %vm510_vm4, %v876_v40 }
 0x6f6   : > { %1985 = vmatmul.msk.f32.vlgmr.msra.gmra.mxu3 %vm510_vm4, %v821_v39 }
 0x761   : > { %v857_v41 = vpop.f32.mrf.mxu3 }
 0x762   : > { %1989 = vmatpush.msk.msrb.mxu3 %vm335_vm0, %v857_v41 }
 0x76b   : > { %v952_v24 = vpop.f32.mrf.mxu1 }
 0x76c   : > { %1988 = vmatmul.msk.f32.vlgmr.msrb.gmra.mxu2 %vm510_vm4, %v952_v24 }
 0x771   : > { %v912_v23 = vpop.f32.mrf.mxu3 }
 0x772   : > { %1178 = vrot.lane.b32.xlu1 %v912_v23, %s2186_s16  ;;  %1991 = vmatpush.msk.msra.mxu1 %vm335_vm0, %v912_v23 }
 0x779   : > { %v932_v42 = vpop.f32.mrf.mxu3 }
 0x77a   : > { %1987 = vmatmul.msk.f32.vlgmr.msra.gmra.mxu0 %vm510_vm4, %v932_v42 }
 0x7ef   : > { %v998_v49 = vpop.f32.mrf.mxu2 }
 0x7f0   : > { %v1009_v51 = vsel %vm1005_vm8, 0.0, %v998_v49 }
 0x7f1   : > { %v1014_v33 = vsel %vm1010_vm9, %v1009_v51, 0.0 }
 0x7f7   : > { %v975_v30 = vpop.f32.mrf.mxu0 }
 0x7f8   : > { %v1008_v25 = vsel %vm1005_vm8, 0.0, %v975_v30 }
 0x7f9   : > { %v1011_v48 = vsel %vm1010_vm9, %v1008_v25, 0.0 }
 0x7fa   : > { %1012 = vadd.xlane.f32.xlu2 %v1011_v48 }
 0x802   : > { %1015 = vadd.xlane.f32.xlu2 %v1014_v33 }
 0x86d   : > { %v1013_v47 = vpop.xlane.xlu2 %1012 }
 0x86e   : > { %2100 = vrsqrt.f32 %v1013_v47  ;;  %vm1024_vm4 = vcmp.eq.f32.partialorder %v1013_v47, inf  ;;  %v1027_v9 = vand.u32 2147483648, %v1013_v47  ;;  %vm1026_vm11 = vcmp.eq.f32.partialorder %v1013_v47, 0.0 }
 0x874   : > { %v2101_v45 = vpop.eup %2100 }
 0x875   : > { %v1018_v53 = vmul.f32 %v2101_v45, %v1013_v47  ;;  %v1016_v52 = vpop.xlane.xlu2 %1015 }
 0x876   : > { %2102 = vrsqrt.f32 %v1016_v52  ;;  %vm1036_vm12 = vcmp.eq.f32.partialorder %v1016_v52, inf  ;;  %v1039_v3 = vand.u32 2147483648, %v1016_v52  ;;  %vm1038_vm13 = vcmp.eq.f32.partialorder %v1016_v52, 0.0 }
 0x877   : > { %v1019_v50 = vmul.f32 %v2101_v45, %v1018_v53 }
 0x879   : > { %v1020_v54 = vmul.f32 0.5, %v1019_v50 }
 0x87b   : > { %v1021_v55 = vsub.f32 1.5, %v1020_v54 }
 0x87c   : > { %v2103_v56 = vpop.eup %2102 }
 0x87d   : > { %v1022_v57 = vmul.f32 %v2101_v45, %v1021_v55  ;;  %v1030_v58 = vmul.f32 %v2103_v56, %v1016_v52 }
 0x87f   : > { %v1023_v59 = vmul.f32 %v1022_v57, %v1013_v47  ;;  %v1031_v60 = vmul.f32 %v2103_v56, %v1030_v58 }
 0x881   : > { %v1025_v11 = vsel %vm1024_vm4, %v1013_v47, %v1023_v59  ;;  %v1032_v61 = vmul.f32 0.5, %v1031_v60  ;;  %v2070_v60 = vld [vmem:[#allocation2 + $0xb8] ss:$0 sm:$0xff] }
 0x882   : > { %v1028_v62 = vsel %vm1026_vm11, %v1027_v9, %v1025_v11 }
 0x883   : > { %v1033_v63 = vsub.f32 1.5, %v1032_v61  ;;  %v1041_v0 = vadd.f32 1e-15, %v1028_v62  ;;  %v2071_v61 = vld [vmem:[#allocation2 + $0xc0] ss:$0 sm:$0xff] }
 0x885   : > { %v1034_v1 = vmul.f32 %v2103_v56, %v1033_v63  ;;  %2104 = vrcp.f32 %v1041_v0 }
 0x887   : > { %v1035_v2 = vmul.f32 %v1034_v1, %v1016_v52 }
 0x889   : > { %v1037_v4 = vsel %vm1036_vm12, %v1016_v52, %v1035_v2  ;;  %v2072_v2 = vld [vmem:[#allocation2 + $0xe8] ss:$0 sm:$0xff] }
 0x88a   : > { %v1040_v5 = vsel %vm1038_vm13, %v1039_v3, %v1037_v4 }
 0x88b   : > { %v2105_v6 = vpop.eup %2104  ;;  %v1042_v7 = vadd.f32 1e-15, %v1040_v5 }
 0x88c   : > { %1047 = vxpose.xlu2.b32.start.end [1/1] (short) (narrow) %v2105_v6, 8  ;;  %v1045_v17 = vmul.f32 %v2105_v6, %v1008_v25 }
 0x88d   : > { %2106 = vrcp.f32 %v1042_v7 }
 0x893   : > { %v2107_v8 = vpop.eup %2106 }
 0x894   : > { %1079 = vxpose.xlu0.b32.start.end [1/1] (short) (narrow) %v2107_v8, 8  ;;  %v1046_v21 = vmul.f32 %v2107_v8, %v1009_v51 }
 0x902   : > { %1176 = vrot.lane.b32.xlu0 %v857_v41, %s2186_s16  ;;  %v1179_v41 = vpop.permute.xlu1 %1178 }
 0x925   : > { %v1063_v16 = vpop.trf.xlu2 }
 0x926   : > { %v1111_v18 = vperm.slane %v1063_v16, 0 }
 0x928   : > { %v1113_v19 = vmul.f32 %v1111_v18, %v1045_v17 }
 0x92a   : > { %1990 = vmatmul.msk.f32.vlgmr.msrb.gmra.mxu3 %vm328_vm1, %v1113_v19  ;;  %1999 = vmatpush.msk.msrb.mxu2 %vm335_vm0, %v1113_v19 }
 0x938   : > { %v1095_v20 = vpop.trf.xlu0 }
 0x939   : > { %v1112_v22 = vperm.slane %v1095_v20, 0 }
 0x93b   : > { %v2402_v26 = vmul.f32 %v1112_v22, %v1046_v21 }
 0x93d   : > { %1992 = vmatmul.msk.f32.vlgmr.msra.gmra.mxu1 %vm328_vm1, %v2402_v26 }
 0x974   : > { %v1177_v38 = vpop.permute.xlu0 %1176 }
 0x9ad   : > { %v1147_v39 = vpop.f32.mrf.mxu3 }
 0x9ae   : > { %v1182_v40 = vsel %vm366_vm2, %v1147_v39, %v1177_v38 }
 0x9af   : > { %1187 = vst [vmem:[#allocation1] ss:$2 sm:$0xff] %v1182_v40 }
 0x9ba   : > { %v1173_v24 = vpop.f32.mrf.mxu1 }
 0x9bb   : > { %v1183_v23 = vsel %vm366_vm2, %v1173_v24, %v1179_v41 }
 0x9bc   : > { %1189 = vst [vmem:[#allocation1 + $0x1] ss:$2 sm:$0xff] %v1183_v23 }
 0x9c3   : > { %v1190_v42 = vld.sshfl [vmem:[#allocation1] sm:$0xff pattern:$0x75316420] }
 0x9c4   : > { %1993 = vmatmul.msk.f32.vlgmr.msrb.gmra.mxu0 %vm1191_vm14, %v1190_v42 }
 0xa41   : > { %v1211_v30 = vpop.f32.mrf.mxu0 }
 0xa42   : > { %v1212_v25 = vadd.f32 %v2069_v43, %v1211_v30 }
 0xa44   : > { %v1216_v48 = vsel %vm366_vm2, %v1212_v25, 0.0 }
 0xa45   : > { %1217 = vadd.xlane.f32.xlu2 %v1216_v48 }
 0xab8   : > { %v1218_v49 = vpop.xlane.xlu2 %1217 }
 0xab9   : > { %v1219_v51 = vmul.f32 %v1218_v49, %v2360_v29 }
 0xabb   : > { %v1220_v33 = vsub.f32 %v1212_v25, %v1219_v51 }
 0xabd   : > { %v1221_v47 = vmul.f32 %v1220_v33, %v1220_v33 }
 0xabf   : > { %v1222_v45 = vsel %vm366_vm2, %v1221_v47, 0.0 }
 0xac0   : > { %1223 = vadd.xlane.f32.xlu1 %v1222_v45 }
 0xb33   : > { %v1224_v53 = vpop.xlane.xlu1 %1223 }
 0xb34   : > { %v1225_v52 = vmul.f32 %v1224_v53, %v2360_v29 }
 0xb36   : > { %v1226_v50 = vadd.f32 1e-05, %v1225_v52 }
 0xb38   : > { %2108 = vrsqrt.f32 %v1226_v50  ;;  %vm1233_vm3 = vweird.f32 %v1226_v50 }
 0xb3e   : > { %v2109_v54 = vpop.eup %2108 }
 0xb3f   : > { %v1228_v55 = vmul.f32 %v2109_v54, %v1226_v50  ;;  %vm1234_vm15 = vweird.f32 %v2109_v54 }
 0xb40   : > { %vm1235_vm5 = vmor %vm1233_vm3, %vm1234_vm15 }
 0xb41   : > { %v1229_v56 = vmul.f32 %v2109_v54, %v1228_v55 }
 0xb43   : > { %v1230_v57 = vmul.f32 0.5, %v1229_v56 }
 0xb45   : > { %v1231_v58 = vsub.f32 1.5, %v1230_v57 }
 0xb47   : > { %v1232_v59 = vmul.f32 %v2109_v54, %v1231_v58 }
 0xb49   : > { %v1236_v9 = vsel %vm1235_vm5, %v2109_v54, %v1232_v59 }
 0xb4a   : > { %v1237_v11 = vmul.f32 %v1236_v9, %v1220_v33 }
 0xb4c   : > { %v1239_v62 = vmul.f32 %v2070_v60, %v1237_v11 }
 0xb4e   : > { %v1241_v63 = vadd.f32 %v2071_v61, %v1239_v62 }
 0xb50   : > { %v1242_v0 = vmax.f32 %v1241_v63, 0.0 }
 0xb52   : > { %1994 = vmatmul.msk.f32.vlgmr.msra.gmra.mxu2 %vm366_vm2, %v1242_v0  ;;  %1995 = vmatpush.msk.msra.mxu3 %vm335_vm0, %v1242_v0  ;;  %v1272_v1 = vrot.slane %v1242_v0, 4 }
 0xb54   : > { %2001 = vmatpush.msk.msrb.mxu3 %vm335_vm0, %v2402_v26  ;;  %1997 = vmatpush.msk.msrb.mxu1 %vm335_vm0, %v1272_v1 }
 0xbd5   : > { %v1269_v3 = vpop.f32.mrf.mxu2 }
 0xbd6   : > { %v1270_v4 = vadd.f32 %v2072_v2, %v1269_v3 }
 0xbd8   : > { %v1277_v5 = vsel %vm1276_vm6, %v1270_v4, -inf  ;;  %v1274_v6 = vrot.slane %v1270_v4, 4 }
 0xbd9   : > { %1278 = vmax.xlane.f32.xlu0 %v1277_v5 }
 0xbda   : > { %v1280_v7 = vsel %vm1276_vm6, %v1274_v6, -inf }
 0xbdb   : > { %1281 = vmax.xlane.f32.xlu2 %v1280_v7 }
 0xc4c   : > { %v1279_v8 = vpop.xlane.xlu0 %1278 }
 0xc4d   : > { %v1283_v10 = vsub.f32 %v1270_v4, %v1279_v8 }
 0xc4e   : > { %v1282_v12 = vpop.xlane.xlu2 %1281 }
 0xc4f   : > { %v1285_v13 = vmul.f32 1.442695, %v1283_v10  ;;  %v1284_v15 = vsub.f32 %v1274_v6, %v1282_v12  ;;  %v1623_v10 = vld [vmem:[#allocation2 + $0x128] sm:$0xff]  ;;  %v1622_v12 = vld [vmem:[#allocation2 + $0x120] sm:$0xff] }
 0xc51   : > { %2110 = vpow2.f32 %v1285_v13  ;;  %v1287_v16 = vmul.f32 1.442695, %v1284_v15  ;;  %v1621_v13 = vld [vmem:[#allocation2 + $0x118] sm:$0xff]  ;;  %v1619_v15 = vld [vmem:[#allocation2 + $0x108] sm:$0xff] }
 0xc53   : > { %2112 = vpow2.f32 %v1287_v16  ;;  %v1618_v16 = vld [vmem:[#allocation2 + $0x100] sm:$0xff] }
 0xc57   : > { %v2111_v17 = vpop.eup %2110 }
 0xc58   : > { %v1289_v18 = vsel %vm1276_vm6, %v2111_v17, 0.0 }
 0xc59   : > { %v2113_v19 = vpop.eup %2112  ;;  %1290 = vadd.xlane.f32.xlu2 %v1289_v18  ;;  %v1616_v18 = vld [vmem:[#allocation2 + $0xf0] sm:$0xff] }
 0xc5a   : > { %v1292_v20 = vsel %vm1276_vm6, %v2113_v19, 0.0 }
 0xc5b   : > { %1293 = vadd.xlane.f32.xlu1 %v1292_v20 }
 0xccc   : > { %v1291_v21 = vpop.xlane.xlu2 %1290 }
 0xccd   : > { %2114 = vrcp.f32 %v1291_v21 }
 0xcce   : > { %v1294_v22 = vpop.xlane.xlu1 %1293 }
 0xccf   : > { %2116 = vrcp.f32 %v1294_v22 }
 0xcd3   : > { %v2115_v26 = vpop.eup %2114 }
 0xcd4   : > { %v1297_v27 = vmul.f32 %v2115_v26, %v2111_v17  ;;  %v1617_v17 = vld [vmem:[#allocation2 + $0xf8] sm:$0xff] }
 0xcd5   : > { %v2117_v28 = vpop.eup %2116 }
 0xcd6   : > { %1299 = vxpose.xlu2.b32.start.end [1/1] (short) (narrow) %v1297_v27, 8  ;;  %2003 = vmatpush.msk.msra.mxu1 %vm335_vm0, %v1297_v27  ;;  %v1298_v31 = vmul.f32 %v2117_v28, %v2113_v19 }
 0xcd8   : > { %1356 = vxpose.xlu1.b32.start.end [1/1] (short) (narrow) %v1298_v31, 8  ;;  %2005 = vmatpush.msk.msra.mxu0 %vm335_vm0, %v1298_v31  ;;  %vm1511_vm0 = vcmask 9216   ;;  %v2073_v31 = vld [vmem:[#allocation2 + $0x130] ss:$0 sm:$0xff] }
 0xd2b   : > { %2063 = vset.pattern.permute.xlu1 %v2182_v14 }
 0xd6f   : > { %v1315_v32 = vpop.trf.xlu2 }
 0xd70   : > { %2000 = vmatmul.msk.f32.vlgmr.msrb.gmra.mxu2 %vm328_vm1, %v1315_v32  ;;  %1996 = vmatmul.msk.f32.vlgmr.msra.gmra.mxu3 %vm328_vm1, %v1315_v32 }
 0xd7c   : > { %v1372_v34 = vpop.trf.xlu1 }
 0xd7d   : > { %1998 = vmatmul.msk.f32.vlgmr.msrb.gmra.mxu1 %vm328_vm1, %v1372_v34  ;;  %2002 = vmatmul.msk.f32.vlgmr.msrb.gmra.mxu3 %vm328_vm1, %v1372_v34 }
 0xd7e   : > { %1703 = vmatpush.msrb.mxu1 %v1623_v10 }
 0xd80   : > { %1704 = vmatpush.msrb.mxu1 %v1622_v12  ;;  %v2188_v12 = vmov 2.0  }
 0xd82   : > { %1705 = vmatpush.msrb.mxu1 %v1621_v13 }
 0xdf3   : > { %v1432_v35 = vpop.f32.mrf.mxu2  ;;  %v1353_v36 = vpop.f32.mrf.mxu3 }
 0xdf4   : > { %2004 = vmatmul.msk.f32.vlgmr.msra.gmra.mxu1 %vm328_vm1, %v1432_v35  ;;  %2007 = vmatpush.msk.msra.mxu2 %vm1628_vm7, %v1353_v36 }
 0xdfa   : > { %v1410_v37 = vpop.f32.mrf.mxu1 }
 0xdfb   : > { %1680 = vrot.lane.b32.xlu1 %v1410_v37, %s2186_s16  ;;  %2009 = vmatpush.msk.msra.mxu3 %vm1628_vm7, %v1410_v37  ;;  %vm1855_vm7 = vcmask 8192  }
 0xe00   : > { %v1454_v38 = vpop.f32.mrf.mxu3 }
 0xe01   : > { %2006 = vmatmul.msk.f32.vlgmr.msra.gmra.mxu0 %vm328_vm1, %v1454_v38 }
 0xe6d   : > { %v1681_v22 = vpop.permute.xlu1 %1680 }
 0xe71   : > { %v1480_v39 = vpop.f32.mrf.mxu1 }
 0xe72   : > { %v1509_v40 = vsel %vm1005_vm8, 0.0, %v1480_v39 }
 0xe73   : > { %v1512_v41 = vsel %vm1511_vm0, %v1509_v40, 0.0 }
 0xe74   : > { %1513 = vadd.xlane.f32.xlu0 %v1512_v41  ;;  %v1748_v41 = vld [vmem:[#allocation2 + $0x160] sm:$0xff] }
 0xe75   : > { %1766 = vmatpush.msrb.mxu0 %v1748_v41 }
 0xe7e   : > { %v1506_v24 = vpop.f32.mrf.mxu0 }
 0xe7f   : > { %v1510_v23 = vsel %vm1005_vm8, 0.0, %v1506_v24  ;;  %v1747_v24 = vld [vmem:[#allocation2 + $0x158] sm:$0xff] }
 0xe80   : > { %v1515_v42 = vsel %vm1511_vm0, %v1510_v23, 0.0  ;;  %1767 = vmatpush.msrb.mxu0 %v1747_v24 }
 0xe81   : > { %1516 = vadd.xlane.f32.xlu0 %v1515_v42  ;;  %v1745_v42 = vld [vmem:[#allocation2 + $0x148] sm:$0xff] }
 0xee7   : > { %v1514_v43 = vpop.xlane.xlu0 %1513 }
 0xee8   : > { %2118 = vrsqrt.f32 %v1514_v43  ;;  %vm1525_vm1 = vcmp.eq.f32.partialorder %v1514_v43, inf  ;;  %v1528_v53 = vand.u32 2147483648, %v1514_v43  ;;  %vm1527_vm9 = vcmp.eq.f32.partialorder %v1514_v43, 0.0 }
 0xeee   : > { %v2119_v30 = vpop.eup %2118 }
 0xeef   : > { %v1519_v25 = vmul.f32 %v2119_v30, %v1514_v43 }
 0xef1   : > { %v1520_v48 = vmul.f32 %v2119_v30, %v1519_v25 }
 0xef3   : > { %v1521_v49 = vmul.f32 0.5, %v1520_v48 }
 0xef4   : > { %v1517_v51 = vpop.xlane.xlu0 %1516 }
 0xef5   : > { %v1522_v33 = vsub.f32 1.5, %v1521_v49  ;;  %2120 = vrsqrt.f32 %v1517_v51  ;;  %vm1537_vm8 = vcmp.eq.f32.partialorder %v1517_v51, inf  ;;  %v1540_v11 = vand.u32 2147483648, %v1517_v51 }
 0xef6   : > { %vm1539_vm4 = vcmp.eq.f32.partialorder %v1517_v51, 0.0 }
 0xef7   : > { %v1523_v47 = vmul.f32 %v2119_v30, %v1522_v33  ;;  %v1777_v30 = vld [vmem:[#allocation2 + $0x180] sm:$0xff] }
 0xef9   : > { %v1524_v45 = vmul.f32 %v1523_v47, %v1514_v43 }
 0xefb   : > { %v2121_v52 = vpop.eup %2120  ;;  %v1526_v50 = vsel %vm1525_vm1, %v1514_v43, %v1524_v45  ;;  %v1778_v43 = vld [vmem:[#allocation2 + $0x188] sm:$0xff] }
 0xefc   : > { %v1529_v44 = vsel %vm1527_vm9, %v1528_v53, %v1526_v50  ;;  %v1531_v54 = vmul.f32 %v2121_v52, %v1517_v51  ;;  %1796 = vmatpush.msrb.mxu2 %v1778_v43  ;;  %v2074_v50 = vld [vmem:[#allocation2 + $0x138] ss:$0 sm:$0xff] }
 0xefd   : > { %v1542_v55 = vadd.f32 1e-15, %v1529_v44 }
 0xefe   : > { %v1532_v56 = vmul.f32 %v2121_v52, %v1531_v54  ;;  %1797 = vmatpush.msrb.mxu2 %v1777_v30 }
 0xeff   : > { %2122 = vrcp.f32 %v1542_v55  ;;  %v2075_v55 = vld [vmem:[#allocation2 + $0x140] ss:$0 sm:$0xff] }
 0xf00   : > { %v1533_v57 = vmul.f32 0.5, %v1532_v56 }
 0xf02   : > { %v1534_v58 = vsub.f32 1.5, %v1533_v57 }
 0xf04   : > { %v1535_v59 = vmul.f32 %v2121_v52, %v1534_v58 }
 0xf05   : > { %v2123_v60 = vpop.eup %2122 }
 0xf06   : > { %v1536_v9 = vmul.f32 %v1535_v59, %v1517_v51  ;;  %1548 = vxpose.xlu0.b32.start.end [1/1] (short) (narrow) %v2123_v60, 8  ;;  %v1546_v2 = vmul.f32 %v2123_v60, %v1509_v40  ;;  %v1775_v59 = vld [vmem:[#allocation2 + $0x170] sm:$0xff]  ;;  %v2076_v60 = vld [vmem:[#allocation2 + $0x168] ss:$0 sm:$0xff] }
 0xf08   : > { %v1538_v61 = vsel %vm1537_vm8, %v1517_v51, %v1536_v9 }
 0xf09   : > { %v1541_v62 = vsel %vm1539_vm4, %v1540_v11, %v1538_v61 }
 0xf0a   : > { %v1543_v63 = vadd.f32 1e-15, %v1541_v62  ;;  %v2077_v62 = vld [vmem:[#allocation2 + $0x190] ss:$0 sm:$0xff] }
 0xf0c   : > { %2124 = vrcp.f32 %v1543_v63 }
 0xf12   : > { %v2125_v0 = vpop.eup %2124 }
 0xf13   : > { %1580 = vxpose.xlu2.b32.start.end [1/1] (short) (narrow) %v2125_v0, 8  ;;  %v1547_v6 = vmul.f32 %v2125_v0, %v1510_v23  ;;  %v1746_v23 = vld [vmem:[#allocation2 + $0x150] sm:$0xff] }
 0xf14   : > { %1768 = vmatpush.msrb.mxu0 %v1746_v23 }
 0xf16   : > { %1769 = vmatpush.msrb.mxu0 %v1745_v42 }
 0xf6d   : > { %2064 = vset.pattern.permute.xlu0 %v2182_v14  ;;  %v1620_v14 = vld [vmem:[#allocation2 + $0x110] sm:$0xff] }
 0xf6e   : > { %1706 = vmatpush.msrb.mxu1 %v1620_v14 }
 0xf70   : > { %1707 = vmatpush.msrb.mxu1 %v1619_v15 }
 0xf72   : > { %1708 = vmatpush.msrb.mxu1 %v1618_v16 }
 0xf74   : > { %1709 = vmatpush.msrb.mxu1 %v1617_v17 }
 0xf76   : > { %1710 = vmatpush.msrb.mxu1 %v1616_v18 }
 0xf7c   : > { %1678 = vrot.lane.b32.xlu2 %v1353_v36, %s2186_s16 }
 0xfaa   : > { %v1564_v1 = vpop.trf.xlu0 }
 0xfab   : > { %v1612_v3 = vperm.slane %v1564_v1, 0 }
 0xfac   : > { %v1596_v4 = vpop.trf.xlu2 }
 0xfad   : > { %v1614_v5 = vmul.f32 %v1612_v3, %v1546_v2  ;;  %v1613_v7 = vperm.slane %v1596_v4, 0 }
 0xfaf   : > { %v1615_v8 = vmul.f32 %v1613_v7, %v1547_v6  ;;  %2008 = vmatmul.msk.f32.vlgmr.msra.gmra.mxu2 %vm634_vm10, %v1614_v5 }
 0xfb1   : > { %2010 = vmatmul.msk.f32.vlgmr.msra.gmra.mxu3 %vm634_vm10, %v1615_v8  ;;  %vm1717_vm10 = vcmask 257024  }
 0xfd6   : > { %v1679_v19 = vpop.permute.xlu2 %1678 }
0x1032   : > { %v1649_v20 = vpop.f32.mrf.mxu2 }
0x1033   : > { %v1684_v21 = vsel %vm366_vm2, %v1649_v20, %v1679_v19 }
0x1034   : > { %1689 = vst [vmem:[#allocation1] ss:$4 sm:$0xff] %v1684_v21  ;;  %v1675_v26 = vpop.f32.mrf.mxu3 }
0x1035   : > { %v1685_v27 = vsel %vm366_vm2, %v1675_v26, %v1681_v22 }
0x1036   : > { %1691 = vst [vmem:[#allocation1 + $0x1] ss:$4 sm:$0xff] %v1685_v27 }
0x103d   : > { %v1692_v28 = vld.sshfl [vmem:[#allocation1] sm:$0xff pattern:$0x73625140] }
0x103e   : > { %2011 = vmatmul.msk.f32.vlgmr.msrb.gmra.mxu1 %vm1191_vm14, %v1692_v28  ;;  %vm1819_vm14 = vcmask 1041409  }
0x10bb   : > { %v1712_v32 = vpop.f32.mrf.mxu1 }
0x10bc   : > { %v1713_v34 = vadd.f32 %v2073_v31, %v1712_v32 }
0x10be   : > { %v1718_v35 = vsel %vm1717_vm10, %v1713_v34, 0.0 }
0x10bf   : > { %1719 = vadd.xlane.f32.xlu0 %v1718_v35 }
0x1132   : > { %v1720_v36 = vpop.xlane.xlu0 %1719 }
0x1133   : > { %v1721_v37 = vmul.f32 %v1720_v36, %v2360_v29 }
0x1135   : > { %v1722_v38 = vsub.f32 %v1713_v34, %v1721_v37 }
0x1137   : > { %v1723_v39 = vmul.f32 %v1722_v38, %v1722_v38 }
0x1139   : > { %v1724_v40 = vsel %vm1717_vm10, %v1723_v39, 0.0 }
0x113a   : > { %1725 = vadd.xlane.f32.xlu2 %v1724_v40 }
0x11ad   : > { %v1726_v25 = vpop.xlane.xlu2 %1725 }
0x11ae   : > { %v1727_v48 = vmul.f32 %v1726_v25, %v2360_v29  ;;  %v1776_v29 = vld [vmem:[#allocation2 + $0x178] sm:$0xff] }
0x11af   : > { %1798 = vmatpush.msrb.mxu2 %v1776_v29 }
0x11b0   : > { %v1728_v49 = vadd.f32 1e-05, %v1727_v48 }
0x11b1   : > { %1799 = vmatpush.msrb.mxu2 %v1775_v59 }
0x11b2   : > { %2126 = vrsqrt.f32 %v1728_v49  ;;  %vm1735_vm12 = vweird.f32 %v1728_v49 }
0x11b3   : > { %2128 = vrcp.f32 %v2188_v12 }
0x11b8   : > { %v2127_v51 = vpop.eup %2126 }
0x11b9   : > { %v1730_v33 = vmul.f32 %v2127_v51, %v1728_v49  ;;  %vm1736_vm11 = vweird.f32 %v2127_v51  ;;  %v2129_v13 = vpop.eup %2128 }
0x11ba   : > { %vm1737_vm13 = vmor %vm1735_vm12, %vm1736_vm11  ;;  %v1826_v14 = vmul.f32 2.0, %v2129_v13 }
0x11bb   : > { %v1731_v47 = vmul.f32 %v2127_v51, %v1730_v33 }
0x11bc   : > { %v1827_v15 = vsub.f32 1.0, %v1826_v14 }
0x11bd   : > { %v1732_v45 = vmul.f32 0.5, %v1731_v47 }
0x11be   : > { %v1828_v16 = vmul.f32 %v2129_v13, %v1827_v15 }
0x11bf   : > { %v1733_v53 = vsub.f32 1.5, %v1732_v45 }
0x11c0   : > { %v1829_v17 = vadd.f32 %v2129_v13, %v1828_v16 }
0x11c1   : > { %v1734_v52 = vmul.f32 %v2127_v51, %v1733_v53 }
0x11c3   : > { %v1738_v44 = vsel %vm1737_vm13, %v2127_v51, %v1734_v52 }
0x11c4   : > { %v1739_v54 = vmul.f32 %v1738_v44, %v1722_v38 }
0x11c6   : > { %v1741_v56 = vmul.f32 %v2074_v50, %v1739_v54 }
0x11c8   : > { %v1743_v57 = vadd.f32 %v2075_v55, %v1741_v56 }
0x11ca   : > { %v1744_v58 = vmax.f32 %v1743_v57, 0.0 }
0x11cc   : > { %2012 = vmatmul.msk.f32.vlgmr.msrb.gmra.mxu0 %vm366_vm2, %v1744_v58 }
0x1249   : > { %v1771_v9 = vpop.f32.mrf.mxu0 }
0x124a   : > { %v1772_v11 = vadd.f32 %v2076_v60, %v1771_v9 }
0x124c   : > { %v1774_v61 = vmax.f32 %v1772_v11, 0.0 }
0x124e   : > { %2013 = vmatmul.msk.f32.vlgmr.msrb.gmra.mxu2 %vm366_vm2, %v1774_v61  ;;  %vm1830_vm2 = vweird.f32 %v2129_v13 }
0x124f   : > { %v1831_v18 = vsel %vm1830_vm2, %v2129_v13, %v1829_v17 }
0x12d1   : > { %v1801_v63 = vpop.f32.mrf.mxu2 }
0x12d2   : > { %v1802_v0 = vadd.f32 %v2077_v62, %v1801_v63 }
0x12d4   : > { %v1805_v1 = vrot.slane %v1802_v0, 2  ;;  %1806 = vst [vmem:[#allocation1] ss:$4 sm:$0xff] %v1802_v0 }
0x12d6   : > { %1809 = vst [vmem:[#allocation1 + $0x20] ss:$4 sm:$0xff] %v1805_v1 }
0x12db   : > { %v1807_v2 = vld.sshfl [vmem:[#allocation1] sm:$0xff pattern:$0x73625140] }
0x12dc   : > { %1812 = vperm.xlu1 %2063, %v1807_v2  }
0x12dd   : > { %v1810_v3 = vld.sshfl [vmem:[#allocation1 + $0x20] sm:$0xff pattern:$0x73625140] }
0x12e4   : > { %1815 = vperm.xlu1 %2063, %v1810_v3  }
0x134e   : > { %v1813_v4 = vpop.permute.xlu1 %1812 }
0x134f   : > { %v1817_v6 = vperm.slane %v1813_v4, %v2389_v46 }
0x1356   : > { %v1816_v5 = vpop.permute.xlu1 %1815 }
0x1357   : > { %v1818_v7 = vperm.slane %v1816_v5, %v2389_v46 }
0x1359   : > { %v1820_v8 = vsel %vm1819_vm14, %v1818_v7, %v1817_v6 }
0x135a   : > { %v1822_v10 = vsel %vm1511_vm0, %v1820_v8, 0.0 }
0x135b   : > { %1823 = vadd.xlane.f32.xlu1 %v1822_v10 }
0x13ce   : > { %v1824_v19 = vpop.xlane.xlu1 %1823 }
0x13cf   : > { %v1832_v20 = vmul.f32 %v1831_v18, %v1824_v19 }
0x13d1   : > { %v1833_v21 = vsub.f32 0.0, %v1832_v20 }
0x13d3   : > { %v1834_v22 = vmul.f32 1.442695, %v1833_v21 }
0x13d5   : > { %2130 = vpow2.f32 %v1834_v22 }
0x13db   : > { %v2131_v26 = vpop.eup %2130 }
0x13dc   : > { %v1836_v27 = vadd.f32 1.0, %v2131_v26 }
0x13de   : > { %2132 = vrcp.f32 %v1836_v27  ;;  %v1848_v34 = vand.u32 2147483648, %v1836_v27  ;;  %v1846_v36 = vand.u32 2147483647, %v1836_v27  ;;  %vm1842_vm3 = vweird.f32 %v1836_v27 }
0x13e0   : > { %v1849_v38 = vor.u32 1.1754944e-38, %v1848_v34  ;;  %vm1847_vm6 = vcmp.eq.f32.partialorder %v1846_v36, 8.507059e+37 }
0x13e4   : > { %v2133_v28 = vpop.eup %2132 }
0x13e5   : > { %v1838_v31 = vmul.f32 %v2133_v28, %v1836_v27  ;;  %vm1843_vm15 = vweird.f32 %v2133_v28 }
0x13e6   : > { %vm1844_vm5 = vmor %vm1842_vm3, %vm1843_vm15 }
0x13e7   : > { %v1839_v32 = vsub.f32 1.0, %v1838_v31 }
0x13e9   : > { %v1840_v35 = vmul.f32 %v2133_v28, %v1839_v32 }
0x13eb   : > { %v1841_v37 = vadd.f32 %v2133_v28, %v1840_v35 }
0x13ed   : > { %v1845_v39 = vsel %vm1844_vm5, %v2133_v28, %v1841_v37 }
0x13ee   : > { %v1850_v40 = vsel %vm1847_vm6, %v1849_v38, %v1845_v39 }
0x13ef   : > { %v1853_v41 = vperm.slane %v1850_v40, %v2389_v46 }
0x13f1   : > { %1856 = vst.msk [vmem:[%s308_s24] sm:$0x1] %vm1855_vm7, %v1853_v41 }
0x13f2 PF: > { %s16_s18 = sadd.s32 1, %s2174_s18  }
0x13f3   : > { %p13_p8 = scmp.ge.s32.totalorder %s16_s18, 4  }
0x13f5   :  { %15 = sbr.rel (!%p13_p8) target bundleno = 1 (0x1), region = 87 }
0x13fa   :  { %1874 = vsyncpa [#allocation3], 1 }
0x13fb   :  { %1876 = vsyncpa [#allocation3 + $0x1], 1 }

</bundles_post_ra>
